<compile_context>
chip_gen: v7x
topology: tpu7x:2x2x1
jax: 0.10.0
libtpu: 0.0.40
codegen_flags: <defaults>
</compile_context>

<pallas_src>
import functools

import numpy as np
import jax
import jax.numpy as jnp
from jax.experimental import pallas as pl
from jax.experimental.pallas import tpu as pltpu


# ----------------------------------------------------------------------------
# Host-side precomputed linear maps (static shapes only)
# ----------------------------------------------------------------------------
def _bilinear_matrix_ac(n_out, n_in):
    """1-D factor of F.interpolate(mode='bilinear', align_corners=True)."""
    m = np.zeros((n_out, n_in), np.float64)
    if n_out == 1 or n_in == 1:
        coords = np.zeros((n_out,), np.float64)
    else:
        coords = np.arange(n_out, dtype=np.float64) * ((n_in - 1) / (n_out - 1))
    for o, c in enumerate(coords):
        i0 = min(int(np.floor(c)), n_in - 1)
        i1 = min(i0 + 1, n_in - 1)
        w = c - i0
        m[o, i0] += 1.0 - w
        m[o, i1] += w
    return m


def _avgpool3s2p1_matrix(n_in):
    """1-D factor of avg_pool2d(k=3, s=2, p=1), count_include_pad=True."""
    n_out = (n_in - 1) // 2 + 1
    m = np.zeros((n_out, n_in), np.float64)
    for o in range(n_out):
        for k in range(3):
            i = 2 * o - 1 + k
            if 0 <= i < n_in:
                m[o, i] = 1.0 / 3.0
    return m


def _resize_map_t(h_out, w_out, h_in, w_in):
    """Transposed (S_in, S_out) map: bilinear align_corners resize, flattened."""
    m = np.kron(_bilinear_matrix_ac(h_out, h_in), _bilinear_matrix_ac(w_out, w_in))
    return m.T.astype(np.float32)


def _pool_resize_map_t(h_in, w_in, h_out, w_out):
    """Transposed (S_in, S_out) map: avg_pool2d(3,2,1) then bilinear resize."""
    py, px = _avgpool3s2p1_matrix(h_in), _avgpool3s2p1_matrix(w_in)
    ry = _bilinear_matrix_ac(h_out, py.shape[0])
    rx = _bilinear_matrix_ac(w_out, px.shape[0])
    return (np.kron(ry @ py, rx @ px)).T.astype(np.float32)


# ----------------------------------------------------------------------------
# Fused kernel: input projections + all BiFPN layers, channel-major (C, S)
# ----------------------------------------------------------------------------
def _make_bifpn_kernel(n_layers, last_pool):
    f32, bf16 = jnp.float32, jnp.bfloat16

    def kernel(x3_ref, x4_ref, x5_ref, x6_ref, x7_ref,
               w3_ref, b3_ref, w4_ref, b4_ref, w5_ref, b5_ref,
               w6_ref, b6_ref, w7_ref, b7_ref,
               lw_ref, lb_ref, r65t_ref, r43t_ref, a34t_ref, a56t_ref,
               o3_ref, o4_ref, o5_ref, o6_ref, o7_ref):

        def swish(y):
            return y * jax.nn.sigmoid(y)

        def mm(a, b):
            # bf16 MXU operands, f32 accumulation.
            return jnp.dot(a.astype(bf16), b.astype(bf16),
                           preferred_element_type=f32)

        def proj(x_ref, w_ref, b_ref):
            # Folded Conv1x1 + BN + swish:  (C, Cin) @ (Cin, S) + (C, 1)
            return swish(mm(w_ref[...], x_ref[0]) + b_ref[...])

        def conv_cat(l, wi, bi, a, b):
            # 1x1 conv over channel-concat([a, b]) == Wa @ a + Wb @ b  (no cat)
            y = mm(lw_ref[l, wi], a) + mm(lw_ref[l, wi + 1], b)
            return swish(y + lb_ref[l, bi])

        def conv(l, wi, bi, x):
            return swish(mm(lw_ref[l, wi], x) + lb_ref[l, bi])

        def layer(l, get3, get4, get5, get6, get7):
            # Each level is produced at its point of first use (live-range bound).
            p6 = get6()
            p7 = get7()
            p6_mid = conv_cat(l, 0, 0, p6, p7)
            u65 = mm(p6_mid, r65t_ref[...])            # resize p6_mid -> S5
            p5 = get5()
            p5_mid = conv_cat(l, 2, 1, p5, u65)
            p4 = get4()
            p4_mid = conv_cat(l, 4, 2, p4, p5)         # raw p5 (matches reference)
            u43 = mm(p4_mid, r43t_ref[...])            # resize p4_mid -> S3
            p3 = get3()
            p3_out = conv_cat(l, 6, 3, p3, u43)
            d34 = mm(p3_out, a34t_ref[...])            # avgpool(3,2,1)+resize -> S4
            p4_out = conv(l, 8, 4, p4 + p4_mid + d34)
            p5_out = conv(l, 9, 5, p5 + p5_mid + p4_out)
            if last_pool:
                p6_in = p6 + p6_mid + mm(p5_out, a56t_ref[...])
            else:
                p6_in = p6 + p6_mid + p5_out           # requires S5 == S6
            p6_out = conv(l, 10, 6, p6_in)
            p7_out = conv(l, 11, 7, p7 + p6_out)
            return p3_out, p4_out, p5_out, p6_out, p7_out

        # Layer-0 inputs are lazy projections; later layers carry values.
        feats = (lambda: proj(x3_ref, w3_ref, b3_ref),
                 lambda: proj(x4_ref, w4_ref, b4_ref),
                 lambda: proj(x5_ref, w5_ref, b5_ref),
                 lambda: proj(x6_ref, w6_ref, b6_ref),
                 lambda: proj(x7_ref, w7_ref, b7_ref))
        for l in range(n_layers):
            vals = layer(l, *feats)
            feats = tuple((lambda v=v: v) for v in vals)

        p3_out, p4_out, p5_out, p6_out, p7_out = (f() for f in feats)
        o3_ref[0] = p3_out.astype(o3_ref.dtype)
        o4_ref[0] = p4_out.astype(o4_ref.dtype)
        o5_ref[0] = p5_out.astype(o5_ref.dtype)
        o6_ref[0] = p6_out.astype(o6_ref.dtype)
        o7_ref[0] = p7_out.astype(o7_ref.dtype)

    return kernel


def _const_spec(a):
    zeros = (0,) * a.ndim
    return pl.BlockSpec(a.shape, lambda n, _z=zeros: _z)


def bifpn_forward(params, p3, p4, p5, p6, p7, last_pool=True):
    """NCHW inputs (PyTorch convention) -> list of 5 NCHW pyramid outputs."""
    feats = (p3, p4, p5, p6, p7)
    N = p3.shape[0]
    C = params["inp"][0][0].shape[0]
    hw = [(f.shape[2], f.shape[3]) for f in feats]
    (H3, W3), (H4, W4), (H5, W5), (H6, W6), (H7, W7) = hw
    assert (H4, W4) == (H5, W5) and (H6, W6) == (H7, W7), \
        "reference BiFPN wiring requires p4/p5 and p6/p7 at equal resolution"
    if not last_pool:
        assert (H5, W5) == (H6, W6), \
            "last_pool=False requires p5 and p6 at equal resolution"
    S = [h * w for (h, w) in hw]
    xs = [f.reshape(N, f.shape[1], s) for f, s in zip(feats, S)]  # (N, Cin, S)

    # Static transposed linear maps for the (C, S) orientation (bf16 operands).
    r65t = jnp.asarray(_resize_map_t(H5, W5, H6, W6), jnp.bfloat16)       # (S6,S5)
    r43t = jnp.asarray(_resize_map_t(H3, W3, H4, W4), jnp.bfloat16)       # (S4,S3)
    a34t = jnp.asarray(_pool_resize_map_t(H3, W3, H4, W4), jnp.bfloat16)  # (S3,S4)
    a56t = jnp.asarray(_pool_resize_map_t(H5, W5, H6, W6), jnp.bfloat16)  # (S5,S6)

    lw, lb = params["W"], params["B"]
    n_layers = lw.shape[0]

    in_args, in_specs = [], []
    for x in xs:
        in_args.append(x)
        in_specs.append(pl.BlockSpec((1,) + x.shape[1:], lambda n: (n, 0, 0)))
    for (w, b) in params["inp"]:
        in_args += [w, b]
        in_specs += [_const_spec(w), _const_spec(b)]
    for a in (lw, lb, r65t, r43t, a34t, a56t):
        in_args.append(a)
        in_specs.append(_const_spec(a))

    # Explicit scoped-VMEM budget (matters on v5e's 16 MiB default at larger
    # spatial sizes): 4x headroom over the per-grid-step working set, clamped.
    def _nbytes(a):
        return int(np.prod(a.shape)) * jnp.dtype(a.dtype).itemsize

    per_step = sum(_nbytes(x) // N for x in xs) + sum(C * s * 4 for s in S)
    const = sum(_nbytes(t) for pair in params["inp"] for t in pair)
    const += sum(_nbytes(t) for t in (lw, lb, r65t, r43t, a34t, a56t))
    vmem_limit = int(min(max(4 * per_step + 2 * const, 16 * 2**20), 48 * 2**20))

    outs = pl.pallas_call(
        _make_bifpn_kernel(n_layers, last_pool),
        out_shape=tuple(jax.ShapeDtypeStruct((N, C, s), p3.dtype) for s in S),
        grid=(N,),
        in_specs=in_specs,
        out_specs=tuple(pl.BlockSpec((1, C, s), lambda n: (n, 0, 0)) for s in S),
        compiler_params=pltpu.CompilerParams(
            dimension_semantics=("parallel",),
            vmem_limit_bytes=vmem_limit),
    )(*in_args)

    return [o.reshape(N, C, h, w) for o, (h, w) in zip(outs, hw)]


# ----------------------------------------------------------------------------
# Pure-JAX f32 reference (same folded parameters) for a plumbing check
# ----------------------------------------------------------------------------
def _reference_forward(params, p3, p4, p5, p6, p7, last_pool=True):
    feats = (p3, p4, p5, p6, p7)
    N = p3.shape[0]
    hw = [(f.shape[2], f.shape[3]) for f in feats]
    (H3, W3), (H4, W4), (H5, W5), (H6, W6), (H7, W7) = hw
    S = [h * w for (h, w) in hw]
    xs = [f.reshape(N, f.shape[1], s).astype(jnp.float32)
          for f, s in zip(feats, S)]
    swish = lambda y: y * jax.nn.sigmoid(y)
    P = [swish(jnp.einsum('oc,ncs->nos', w.astype(jnp.float32), x) + b[None])
         for (w, b), x in zip(params["inp"], xs)]
    p3, p4, p5, p6, p7 = P
    r65t = jnp.asarray(_resize_map_t(H5, W5, H6, W6))
    r43t = jnp.asarray(_resize_map_t(H3, W3, H4, W4))
    a34t = jnp.asarray(_pool_resize_map_t(H3, W3, H4, W4))
    a56t = jnp.asarray(_pool_resize_map_t(H5, W5, H6, W6))
    W = params["W"].astype(jnp.float32)
    B = params["B"].astype(jnp.float32)

    def cc(l, wi, bi, a, b):
        y = (jnp.einsum('oc,ncs->nos', W[l, wi], a)
             + jnp.einsum('oc,ncs->nos', W[l, wi + 1], b))
        return swish(y + B[l, bi][None])

    def cv(l, wi, bi, x):
        return swish(jnp.einsum('oc,ncs->nos', W[l, wi], x) + B[l, bi][None])

    for l in range(W.shape[0]):
        p6m = cc(l, 0, 0, p6, p7)
        u65 = jnp.einsum('ncs,st->nct', p6m, r65t)
        p5m = cc(l, 2, 1, p5, u65)
        p4m = cc(l, 4, 2, p4, p5)
        u43 = jnp.einsum('ncs,st->nct', p4m, r43t)
        p3o = cc(l, 6, 3, p3, u43)
        d34 = jnp.einsum('ncs,st->nct', p3o, a34t)
        p4o = cv(l, 8, 4, p4 + p4m + d34)
        p5o = cv(l, 9, 5, p5 + p5m + p4o)
        if last_pool:
            p6in = p6 + p6m + jnp.einsum('ncs,st->nct', p5o, a56t)
        else:
            p6in = p6 + p6m + p5o
        p6o = cv(l, 10, 6, p6in)
        p7o = cv(l, 11, 7, p7 + p6o)
        p3, p4, p5, p6, p7 = p3o, p4o, p5o, p6o, p7o

    return [t.reshape(N, t.shape[1], h, w)
            for t, (h, w) in zip((p3, p4, p5, p6, p7), hw)]


# ----------------------------------------------------------------------------
# Parameter construction (deterministic, synthetic) with BN folded on host
# ----------------------------------------------------------------------------
def _init_conv(key, cin, cout):
    kw, kb = jax.random.split(key)
    w = jax.random.normal(kw, (cout, cin), jnp.float32) / jnp.sqrt(float(cin))
    b = 0.01 * jax.random.normal(kb, (cout,), jnp.float32)
    return w, b


def _bn_scale_shift(key, c, eps=1e-5):
    k1, k2, k3 = jax.random.split(key, 3)
    gamma = 1.0 + 0.1 * jax.random.normal(k1, (c,), jnp.float32)
    beta = 0.1 * jax.random.normal(k2, (c,), jnp.float32)
    mean = 0.1 * jax.random.normal(k3, (c,), jnp.float32)
    var = jnp.ones((c,), jnp.float32)
    scale = gamma / jnp.sqrt(var + eps)
    shift = beta - mean * scale
    return scale, shift


def _conv_bn_folded(key, cin, cout):
    """Conv(1x1) followed by inference-mode BN, folded: (w', b'), w' (Cout,Cin)."""
    k1, k2 = jax.random.split(key)
    w, b = _init_conv(k1, cin, cout)
    scale, shift = _bn_scale_shift(k2, cout)
    return w * scale[:, None], b * scale + shift


def _conv_cat_split(key, c):
    """Conv(2c -> c) over a channel concat, split into two (c, c) halves."""
    w, b = _init_conv(key, c, 2 * c)[0].reshape(c, 2 * c), None  # placeholder
    # (re-draw properly: weight (c, 2c) and bias (c,))
    w, b = _init_conv(key, 2 * c, c)
    return w[:, :c], w[:, c:], b


def init_bifpn_params(key, in_ch=(40, 80, 112, 192, 320), c=32, layers=1):
    keys = jax.random.split(key, 5 + layers)
    inp = []
    for i, cin in enumerate(in_ch):
        w, b = _conv_bn_folded(keys[i], cin, c)
        inp.append((w.astype(jnp.bfloat16), b.reshape(c, 1)))
    Ws, Bs = [], []
    for l in range(layers):
        lk = jax.random.split(keys[5 + l], 8)
        wa67, wb67, b67 = _conv_cat_split(lk[0], c)
        wa56, wb56, b56 = _conv_cat_split(lk[1], c)
        wa45, wb45, b45 = _conv_cat_split(lk[2], c)
        wa34, wb34, b34 = _conv_cat_split(lk[3], c)
        w4, b4 = _conv_bn_folded(lk[4], c, c)
        w5, b5 = _conv_bn_folded(lk[5], c, c)
        w6, b6 = _conv_bn_folded(lk[6], c, c)
        w7, b7 = _conv_bn_folded(lk[7], c, c)
        Ws.append(jnp.stack([wa67, wb67, wa56, wb56, wa45, wb45, wa34, wb34,
                             w4, w5, w6, w7]))                      # (12, c, c)
        Bs.append(jnp.stack([b67, b56, b45, b34, b4, b5, b6, b7]))  # (8, c)
    W = jnp.stack(Ws).astype(jnp.bfloat16)           # (L, 12, c, c)
    B = jnp.stack(Bs).reshape(layers, 8, c, 1)       # (L, 8, c, 1) f32
    return {"inp": inp, "W": W, "B": B}


# ----------------------------------------------------------------------------
if __name__ == "__main__":
    key = jax.random.PRNGKey(0)
    k_in, k_par = jax.random.split(key)
    ki = jax.random.split(k_in, 5)

    # EfficientNet-b1 feature channels (p3..p7), small spatial sizes, NCHW.
    B, C_FPN = 2, 32
    p3 = jax.random.normal(ki[0], (B, 40, 16, 16), jnp.float32)
    p4 = jax.random.normal(ki[1], (B, 80, 8, 8), jnp.float32)
    p5 = jax.random.normal(ki[2], (B, 112, 8, 8), jnp.float32)
    p6 = jax.random.normal(ki[3], (B, 192, 4, 4), jnp.float32)
    p7 = jax.random.normal(ki[4], (B, 320, 4, 4), jnp.float32)

    params = init_bifpn_params(k_par, in_ch=(40, 80, 112, 192, 320),
                               c=C_FPN, layers=1)

    fwd = jax.jit(functools.partial(bifpn_forward, last_pool=True))
    outs = fwd(params, p3, p4, p5, p6, p7)
    outs = [jax.block_until_ready(o) for o in outs]

    expected = [(B, C_FPN, 16, 16), (B, C_FPN, 8, 8), (B, C_FPN, 8, 8),
                (B, C_FPN, 4, 4), (B, C_FPN, 4, 4)]
    assert [tuple(o.shape) for o in outs] == expected
    assert all(bool(jnp.all(jnp.isfinite(o))) for o in outs)

    # Plumbing check against the pure-JAX f32 reference (kernel uses bf16
    # MXU operands, so tolerances are loose).
    refs = _reference_forward(params, p3, p4, p5, p6, p7, last_pool=True)
    for o, r in zip(outs, refs):
        np.testing.assert_allclose(np.asarray(o), np.asarray(r),
                                   rtol=1e-1, atol=2e-1)

    print("KERNEL_OK")
</pallas_src>

<mosaic_0001>
module attributes {stable_mosaic.version = 11 : i64} {
  func.func @kernel(%arg0: i32, %arg1: memref<1x40x256xf32, #tpu.memory_space<vmem>>, %arg2: memref<1x80x64xf32, #tpu.memory_space<vmem>>, %arg3: memref<1x112x64xf32, #tpu.memory_space<vmem>>, %arg4: memref<1x192x16xf32, #tpu.memory_space<vmem>>, %arg5: memref<1x320x16xf32, #tpu.memory_space<vmem>>, %arg6: memref<32x40xbf16, #tpu.memory_space<vmem>>, %arg7: memref<32x1xf32, #tpu.memory_space<vmem>>, %arg8: memref<32x80xbf16, #tpu.memory_space<vmem>>, %arg9: memref<32x1xf32, #tpu.memory_space<vmem>>, %arg10: memref<32x112xbf16, #tpu.memory_space<vmem>>, %arg11: memref<32x1xf32, #tpu.memory_space<vmem>>, %arg12: memref<32x192xbf16, #tpu.memory_space<vmem>>, %arg13: memref<32x1xf32, #tpu.memory_space<vmem>>, %arg14: memref<32x320xbf16, #tpu.memory_space<vmem>>, %arg15: memref<32x1xf32, #tpu.memory_space<vmem>>, %arg16: memref<1x12x32x32xbf16, #tpu.memory_space<vmem>>, %arg17: memref<1x8x32x1xf32, #tpu.memory_space<vmem>>, %arg18: memref<16x64xbf16, #tpu.memory_space<vmem>>, %arg19: memref<64x256xbf16, #tpu.memory_space<vmem>>, %arg20: memref<256x64xbf16, #tpu.memory_space<vmem>>, %arg21: memref<64x16xbf16, #tpu.memory_space<vmem>>, %arg22: memref<1x32x256xf32, #tpu.memory_space<vmem>>, %arg23: memref<1x32x64xf32, #tpu.memory_space<vmem>>, %arg24: memref<1x32x64xf32, #tpu.memory_space<vmem>>, %arg25: memref<1x32x16xf32, #tpu.memory_space<vmem>>, %arg26: memref<1x32x16xf32, #tpu.memory_space<vmem>>) attributes {dimension_semantics = [#tpu.dimension_semantics<parallel>], iteration_bounds = array<i64: 2>, scalar_prefetch = 0 : i64, scratch_operands = 0 : i64, tpu.core_type = #tpu.core_type<tc>, window_params = [{transform_indices = @transform_0, window_bounds = array<i64: 1, 40, 256>}, {transform_indices = @transform_1, window_bounds = array<i64: 1, 80, 64>}, {transform_indices = @transform_2, window_bounds = array<i64: 1, 112, 64>}, {transform_indices = @transform_3, window_bounds = array<i64: 1, 192, 16>}, {transform_indices = @transform_4, window_bounds = array<i64: 1, 320, 16>}, {pipeline_mode = #tpu.pipeline_mode<synchronous>, transform_indices = @transform_5, window_bounds = array<i64: 32, 40>}, {pipeline_mode = #tpu.pipeline_mode<synchronous>, transform_indices = @transform_6, window_bounds = array<i64: 32, 1>}, {pipeline_mode = #tpu.pipeline_mode<synchronous>, transform_indices = @transform_7, window_bounds = array<i64: 32, 80>}, {pipeline_mode = #tpu.pipeline_mode<synchronous>, transform_indices = @transform_8, window_bounds = array<i64: 32, 1>}, {pipeline_mode = #tpu.pipeline_mode<synchronous>, transform_indices = @transform_9, window_bounds = array<i64: 32, 112>}, {pipeline_mode = #tpu.pipeline_mode<synchronous>, transform_indices = @transform_10, window_bounds = array<i64: 32, 1>}, {pipeline_mode = #tpu.pipeline_mode<synchronous>, transform_indices = @transform_11, window_bounds = array<i64: 32, 192>}, {pipeline_mode = #tpu.pipeline_mode<synchronous>, transform_indices = @transform_12, window_bounds = array<i64: 32, 1>}, {pipeline_mode = #tpu.pipeline_mode<synchronous>, transform_indices = @transform_13, window_bounds = array<i64: 32, 320>}, {pipeline_mode = #tpu.pipeline_mode<synchronous>, transform_indices = @transform_14, window_bounds = array<i64: 32, 1>}, {pipeline_mode = #tpu.pipeline_mode<synchronous>, transform_indices = @transform_15, window_bounds = array<i64: 1, 12, 32, 32>}, {pipeline_mode = #tpu.pipeline_mode<synchronous>, transform_indices = @transform_16, window_bounds = array<i64: 1, 8, 32, 1>}, {pipeline_mode = #tpu.pipeline_mode<synchronous>, transform_indices = @transform_17, window_bounds = array<i64: 16, 64>}, {pipeline_mode = #tpu.pipeline_mode<synchronous>, transform_indices = @transform_18, window_bounds = array<i64: 64, 256>}, {pipeline_mode = #tpu.pipeline_mode<synchronous>, transform_indices = @transform_19, window_bounds = array<i64: 256, 64>}, {pipeline_mode = #tpu.pipeline_mode<synchronous>, transform_indices = @transform_20, window_bounds = array<i64: 64, 16>}, {transform_indices = @transform_21, window_bounds = array<i64: 1, 32, 256>}, {transform_indices = @transform_22, window_bounds = array<i64: 1, 32, 64>}, {transform_indices = @transform_23, window_bounds = array<i64: 1, 32, 64>}, {transform_indices = @transform_24, window_bounds = array<i64: 1, 32, 16>}, {transform_indices = @transform_25, window_bounds = array<i64: 1, 32, 16>}]} {
    %c0 = arith.constant 0 : index
    %c0_0 = arith.constant 0 : index
    %0 = vector.load %arg12[%c0, %c0_0] : memref<32x192xbf16, #tpu.memory_space<vmem>>, vector<32x192xbf16>
    %c0_1 = arith.constant 0 : index
    %c0_2 = arith.constant 0 : index
    %c0_3 = arith.constant 0 : index
    %1 = vector.load %arg4[%c0_1, %c0_2, %c0_3] : memref<1x192x16xf32, #tpu.memory_space<vmem>>, vector<1x192x16xf32>
    %2 = vector.shape_cast %1 : vector<1x192x16xf32> to vector<192x16xf32>
    %3 = arith.truncf %2 : vector<192x16xf32> to vector<192x16xbf16>
    %cst = arith.constant dense<0.000000e+00> : vector<32x16xf32>
    %4 = tpu.matmul %0, %3, %cst {dimension_numbers = #tpu.dot_dimension_numbers<[1], [0], [0], [1], [0, 0, 1, 1], [], []>} : vector<32x192xbf16>, vector<192x16xbf16>, vector<32x16xf32> -> vector<32x16xf32>
    %c0_4 = arith.constant 0 : index
    %c0_5 = arith.constant 0 : index
    %5 = vector.load %arg13[%c0_4, %c0_5] : memref<32x1xf32, #tpu.memory_space<vmem>>, vector<32x1xf32>
    %6 = vector.broadcast %5 : vector<32x1xf32> to vector<32x16xf32>
    %7 = arith.addf %4, %6 : vector<32x16xf32>
    %8 = arith.negf %7 : vector<32x16xf32>
    %9 = math.exp %8 : vector<32x16xf32>
    %cst_6 = arith.constant 1.000000e+00 : f32
    %10 = vector.broadcast %cst_6 : f32 to vector<32x16xf32>
    %11 = arith.addf %10, %9 : vector<32x16xf32>
    %12 = arith.divf %10, %11 : vector<32x16xf32>
    %13 = arith.mulf %7, %12 : vector<32x16xf32>
    %c0_7 = arith.constant 0 : index
    %c0_8 = arith.constant 0 : index
    %14 = vector.load %arg14[%c0_7, %c0_8] : memref<32x320xbf16, #tpu.memory_space<vmem>>, vector<32x320xbf16>
    %c0_9 = arith.constant 0 : index
    %c0_10 = arith.constant 0 : index
    %c0_11 = arith.constant 0 : index
    %15 = vector.load %arg5[%c0_9, %c0_10, %c0_11] : memref<1x320x16xf32, #tpu.memory_space<vmem>>, vector<1x320x16xf32>
    %16 = vector.shape_cast %15 : vector<1x320x16xf32> to vector<320x16xf32>
    %17 = arith.truncf %16 : vector<320x16xf32> to vector<320x16xbf16>
    %cst_12 = arith.constant dense<0.000000e+00> : vector<32x16xf32>
    %18 = tpu.matmul %14, %17, %cst_12 {dimension_numbers = #tpu.dot_dimension_numbers<[1], [0], [0], [1], [0, 0, 1, 1], [], []>} : vector<32x320xbf16>, vector<320x16xbf16>, vector<32x16xf32> -> vector<32x16xf32>
    %c0_13 = arith.constant 0 : index
    %c0_14 = arith.constant 0 : index
    %19 = vector.load %arg15[%c0_13, %c0_14] : memref<32x1xf32, #tpu.memory_space<vmem>>, vector<32x1xf32>
    %20 = vector.broadcast %19 : vector<32x1xf32> to vector<32x16xf32>
    %21 = arith.addf %18, %20 : vector<32x16xf32>
    %22 = arith.negf %21 : vector<32x16xf32>
    %23 = math.exp %22 : vector<32x16xf32>
    %cst_15 = arith.constant 1.000000e+00 : f32
    %24 = vector.broadcast %cst_15 : f32 to vector<32x16xf32>
    %25 = arith.addf %24, %23 : vector<32x16xf32>
    %26 = arith.divf %24, %25 : vector<32x16xf32>
    %27 = arith.mulf %21, %26 : vector<32x16xf32>
    %c0_16 = arith.constant 0 : index
    %c0_17 = arith.constant 0 : index
    %c0_18 = arith.constant 0 : index
    %c0_19 = arith.constant 0 : index
    %28 = vector.load %arg16[%c0_16, %c0_17, %c0_18, %c0_19] : memref<1x12x32x32xbf16, #tpu.memory_space<vmem>>, vector<1x1x32x32xbf16>
    %29 = vector.shape_cast %28 : vector<1x1x32x32xbf16> to vector<32x32xbf16>
    %30 = arith.truncf %13 : vector<32x16xf32> to vector<32x16xbf16>
    %cst_20 = arith.constant dense<0.000000e+00> : vector<32x16xf32>
    %31 = tpu.matmul %29, %30, %cst_20 {dimension_numbers = #tpu.dot_dimension_numbers<[1], [0], [0], [1], [0, 0, 1, 1], [], []>} : vector<32x32xbf16>, vector<32x16xbf16>, vector<32x16xf32> -> vector<32x16xf32>
    %c0_21 = arith.constant 0 : index
    %c1 = arith.constant 1 : index
    %c0_22 = arith.constant 0 : index
    %c0_23 = arith.constant 0 : index
    %32 = vector.load %arg16[%c0_21, %c1, %c0_22, %c0_23] : memref<1x12x32x32xbf16, #tpu.memory_space<vmem>>, vector<1x1x32x32xbf16>
    %33 = vector.shape_cast %32 : vector<1x1x32x32xbf16> to vector<32x32xbf16>
    %34 = arith.truncf %27 : vector<32x16xf32> to vector<32x16xbf16>
    %cst_24 = arith.constant dense<0.000000e+00> : vector<32x16xf32>
    %35 = tpu.matmul %33, %34, %cst_24 {dimension_numbers = #tpu.dot_dimension_numbers<[1], [0], [0], [1], [0, 0, 1, 1], [], []>} : vector<32x32xbf16>, vector<32x16xbf16>, vector<32x16xf32> -> vector<32x16xf32>
    %36 = arith.addf %31, %35 : vector<32x16xf32>
    %c0_25 = arith.constant 0 : index
    %c0_26 = arith.constant 0 : index
    %c0_27 = arith.constant 0 : index
    %c0_28 = arith.constant 0 : index
    %37 = vector.load %arg17[%c0_25, %c0_26, %c0_27, %c0_28] : memref<1x8x32x1xf32, #tpu.memory_space<vmem>>, vector<1x1x32x1xf32>
    %38 = vector.shape_cast %37 : vector<1x1x32x1xf32> to vector<32x1xf32>
    %39 = vector.broadcast %38 : vector<32x1xf32> to vector<32x16xf32>
    %40 = arith.addf %36, %39 : vector<32x16xf32>
    %41 = arith.negf %40 : vector<32x16xf32>
    %42 = math.exp %41 : vector<32x16xf32>
    %cst_29 = arith.constant 1.000000e+00 : f32
    %43 = vector.broadcast %cst_29 : f32 to vector<32x16xf32>
    %44 = arith.addf %43, %42 : vector<32x16xf32>
    %45 = arith.divf %43, %44 : vector<32x16xf32>
    %46 = arith.mulf %40, %45 : vector<32x16xf32>
    %c0_30 = arith.constant 0 : index
    %c0_31 = arith.constant 0 : index
    %47 = vector.load %arg18[%c0_30, %c0_31] : memref<16x64xbf16, #tpu.memory_space<vmem>>, vector<16x64xbf16>
    %48 = arith.truncf %46 : vector<32x16xf32> to vector<32x16xbf16>
    %cst_32 = arith.constant dense<0.000000e+00> : vector<32x64xf32>
    %49 = tpu.matmul %48, %47, %cst_32 {dimension_numbers = #tpu.dot_dimension_numbers<[1], [0], [0], [1], [0, 0, 1, 1], [], []>} : vector<32x16xbf16>, vector<16x64xbf16>, vector<32x64xf32> -> vector<32x64xf32>
    %c0_33 = arith.constant 0 : index
    %c0_34 = arith.constant 0 : index
    %50 = vector.load %arg10[%c0_33, %c0_34] : memref<32x112xbf16, #tpu.memory_space<vmem>>, vector<32x112xbf16>
    %c0_35 = arith.constant 0 : index
    %c0_36 = arith.constant 0 : index
    %c0_37 = arith.constant 0 : index
    %51 = vector.load %arg3[%c0_35, %c0_36, %c0_37] : memref<1x112x64xf32, #tpu.memory_space<vmem>>, vector<1x112x64xf32>
    %52 = vector.shape_cast %51 : vector<1x112x64xf32> to vector<112x64xf32>
    %53 = arith.truncf %52 : vector<112x64xf32> to vector<112x64xbf16>
    %cst_38 = arith.constant dense<0.000000e+00> : vector<32x64xf32>
    %54 = tpu.matmul %50, %53, %cst_38 {dimension_numbers = #tpu.dot_dimension_numbers<[1], [0], [0], [1], [0, 0, 1, 1], [], []>} : vector<32x112xbf16>, vector<112x64xbf16>, vector<32x64xf32> -> vector<32x64xf32>
    %c0_39 = arith.constant 0 : index
    %c0_40 = arith.constant 0 : index
    %55 = vector.load %arg11[%c0_39, %c0_40] : memref<32x1xf32, #tpu.memory_space<vmem>>, vector<32x1xf32>
    %56 = vector.broadcast %55 : vector<32x1xf32> to vector<32x64xf32>
    %57 = arith.addf %54, %56 : vector<32x64xf32>
    %58 = arith.negf %57 : vector<32x64xf32>
    %59 = math.exp %58 : vector<32x64xf32>
    %cst_41 = arith.constant 1.000000e+00 : f32
    %60 = vector.broadcast %cst_41 : f32 to vector<32x64xf32>
    %61 = arith.addf %60, %59 : vector<32x64xf32>
    %62 = arith.divf %60, %61 : vector<32x64xf32>
    %63 = arith.mulf %57, %62 : vector<32x64xf32>
    %c0_42 = arith.constant 0 : index
    %c2 = arith.constant 2 : index
    %c0_43 = arith.constant 0 : index
    %c0_44 = arith.constant 0 : index
    %64 = vector.load %arg16[%c0_42, %c2, %c0_43, %c0_44] : memref<1x12x32x32xbf16, #tpu.memory_space<vmem>>, vector<1x1x32x32xbf16>
    %65 = vector.shape_cast %64 : vector<1x1x32x32xbf16> to vector<32x32xbf16>
    %66 = arith.truncf %63 : vector<32x64xf32> to vector<32x64xbf16>
    %cst_45 = arith.constant dense<0.000000e+00> : vector<32x64xf32>
    %67 = tpu.matmul %65, %66, %cst_45 {dimension_numbers = #tpu.dot_dimension_numbers<[1], [0], [0], [1], [0, 0, 1, 1], [], []>} : vector<32x32xbf16>, vector<32x64xbf16>, vector<32x64xf32> -> vector<32x64xf32>
    %c0_46 = arith.constant 0 : index
    %c3 = arith.constant 3 : index
    %c0_47 = arith.constant 0 : index
    %c0_48 = arith.constant 0 : index
    %68 = vector.load %arg16[%c0_46, %c3, %c0_47, %c0_48] : memref<1x12x32x32xbf16, #tpu.memory_space<vmem>>, vector<1x1x32x32xbf16>
    %69 = vector.shape_cast %68 : vector<1x1x32x32xbf16> to vector<32x32xbf16>
    %70 = arith.truncf %49 : vector<32x64xf32> to vector<32x64xbf16>
    %cst_49 = arith.constant dense<0.000000e+00> : vector<32x64xf32>
    %71 = tpu.matmul %69, %70, %cst_49 {dimension_numbers = #tpu.dot_dimension_numbers<[1], [0], [0], [1], [0, 0, 1, 1], [], []>} : vector<32x32xbf16>, vector<32x64xbf16>, vector<32x64xf32> -> vector<32x64xf32>
    %72 = arith.addf %67, %71 : vector<32x64xf32>
    %c0_50 = arith.constant 0 : index
    %c1_51 = arith.constant 1 : index
    %c0_52 = arith.constant 0 : index
    %c0_53 = arith.constant 0 : index
    %73 = vector.load %arg17[%c0_50, %c1_51, %c0_52, %c0_53] : memref<1x8x32x1xf32, #tpu.memory_space<vmem>>, vector<1x1x32x1xf32>
    %74 = vector.shape_cast %73 : vector<1x1x32x1xf32> to vector<32x1xf32>
    %75 = vector.broadcast %74 : vector<32x1xf32> to vector<32x64xf32>
    %76 = arith.addf %72, %75 : vector<32x64xf32>
    %77 = arith.negf %76 : vector<32x64xf32>
    %78 = math.exp %77 : vector<32x64xf32>
    %cst_54 = arith.constant 1.000000e+00 : f32
    %79 = vector.broadcast %cst_54 : f32 to vector<32x64xf32>
    %80 = arith.addf %79, %78 : vector<32x64xf32>
    %81 = arith.divf %79, %80 : vector<32x64xf32>
    %82 = arith.mulf %76, %81 : vector<32x64xf32>
    %c0_55 = arith.constant 0 : index
    %c0_56 = arith.constant 0 : index
    %83 = vector.load %arg8[%c0_55, %c0_56] : memref<32x80xbf16, #tpu.memory_space<vmem>>, vector<32x80xbf16>
    %c0_57 = arith.constant 0 : index
    %c0_58 = arith.constant 0 : index
    %c0_59 = arith.constant 0 : index
    %84 = vector.load %arg2[%c0_57, %c0_58, %c0_59] : memref<1x80x64xf32, #tpu.memory_space<vmem>>, vector<1x80x64xf32>
    %85 = vector.shape_cast %84 : vector<1x80x64xf32> to vector<80x64xf32>
    %86 = arith.truncf %85 : vector<80x64xf32> to vector<80x64xbf16>
    %cst_60 = arith.constant dense<0.000000e+00> : vector<32x64xf32>
    %87 = tpu.matmul %83, %86, %cst_60 {dimension_numbers = #tpu.dot_dimension_numbers<[1], [0], [0], [1], [0, 0, 1, 1], [], []>} : vector<32x80xbf16>, vector<80x64xbf16>, vector<32x64xf32> -> vector<32x64xf32>
    %c0_61 = arith.constant 0 : index
    %c0_62 = arith.constant 0 : index
    %88 = vector.load %arg9[%c0_61, %c0_62] : memref<32x1xf32, #tpu.memory_space<vmem>>, vector<32x1xf32>
    %89 = vector.broadcast %88 : vector<32x1xf32> to vector<32x64xf32>
    %90 = arith.addf %87, %89 : vector<32x64xf32>
    %91 = arith.negf %90 : vector<32x64xf32>
    %92 = math.exp %91 : vector<32x64xf32>
    %cst_63 = arith.constant 1.000000e+00 : f32
    %93 = vector.broadcast %cst_63 : f32 to vector<32x64xf32>
    %94 = arith.addf %93, %92 : vector<32x64xf32>
    %95 = arith.divf %93, %94 : vector<32x64xf32>
    %96 = arith.mulf %90, %95 : vector<32x64xf32>
    %c0_64 = arith.constant 0 : index
    %c4 = arith.constant 4 : index
    %c0_65 = arith.constant 0 : index
    %c0_66 = arith.constant 0 : index
    %97 = vector.load %arg16[%c0_64, %c4, %c0_65, %c0_66] : memref<1x12x32x32xbf16, #tpu.memory_space<vmem>>, vector<1x1x32x32xbf16>
    %98 = vector.shape_cast %97 : vector<1x1x32x32xbf16> to vector<32x32xbf16>
    %99 = arith.truncf %96 : vector<32x64xf32> to vector<32x64xbf16>
    %cst_67 = arith.constant dense<0.000000e+00> : vector<32x64xf32>
    %100 = tpu.matmul %98, %99, %cst_67 {dimension_numbers = #tpu.dot_dimension_numbers<[1], [0], [0], [1], [0, 0, 1, 1], [], []>} : vector<32x32xbf16>, vector<32x64xbf16>, vector<32x64xf32> -> vector<32x64xf32>
    %c0_68 = arith.constant 0 : index
    %c5 = arith.constant 5 : index
    %c0_69 = arith.constant 0 : index
    %c0_70 = arith.constant 0 : index
    %101 = vector.load %arg16[%c0_68, %c5, %c0_69, %c0_70] : memref<1x12x32x32xbf16, #tpu.memory_space<vmem>>, vector<1x1x32x32xbf16>
    %102 = vector.shape_cast %101 : vector<1x1x32x32xbf16> to vector<32x32xbf16>
    %103 = arith.truncf %63 : vector<32x64xf32> to vector<32x64xbf16>
    %cst_71 = arith.constant dense<0.000000e+00> : vector<32x64xf32>
    %104 = tpu.matmul %102, %103, %cst_71 {dimension_numbers = #tpu.dot_dimension_numbers<[1], [0], [0], [1], [0, 0, 1, 1], [], []>} : vector<32x32xbf16>, vector<32x64xbf16>, vector<32x64xf32> -> vector<32x64xf32>
    %105 = arith.addf %100, %104 : vector<32x64xf32>
    %c0_72 = arith.constant 0 : index
    %c2_73 = arith.constant 2 : index
    %c0_74 = arith.constant 0 : index
    %c0_75 = arith.constant 0 : index
    %106 = vector.load %arg17[%c0_72, %c2_73, %c0_74, %c0_75] : memref<1x8x32x1xf32, #tpu.memory_space<vmem>>, vector<1x1x32x1xf32>
    %107 = vector.shape_cast %106 : vector<1x1x32x1xf32> to vector<32x1xf32>
    %108 = vector.broadcast %107 : vector<32x1xf32> to vector<32x64xf32>
    %109 = arith.addf %105, %108 : vector<32x64xf32>
    %110 = arith.negf %109 : vector<32x64xf32>
    %111 = math.exp %110 : vector<32x64xf32>
    %cst_76 = arith.constant 1.000000e+00 : f32
    %112 = vector.broadcast %cst_76 : f32 to vector<32x64xf32>
    %113 = arith.addf %112, %111 : vector<32x64xf32>
    %114 = arith.divf %112, %113 : vector<32x64xf32>
    %115 = arith.mulf %109, %114 : vector<32x64xf32>
    %c0_77 = arith.constant 0 : index
    %c0_78 = arith.constant 0 : index
    %116 = vector.load %arg19[%c0_77, %c0_78] : memref<64x256xbf16, #tpu.memory_space<vmem>>, vector<64x256xbf16>
    %117 = arith.truncf %115 : vector<32x64xf32> to vector<32x64xbf16>
    %cst_79 = arith.constant dense<0.000000e+00> : vector<32x256xf32>
    %118 = tpu.matmul %117, %116, %cst_79 {dimension_numbers = #tpu.dot_dimension_numbers<[1], [0], [0], [1], [0, 0, 1, 1], [], []>} : vector<32x64xbf16>, vector<64x256xbf16>, vector<32x256xf32> -> vector<32x256xf32>
    %c0_80 = arith.constant 0 : index
    %c0_81 = arith.constant 0 : index
    %119 = vector.load %arg6[%c0_80, %c0_81] : memref<32x40xbf16, #tpu.memory_space<vmem>>, vector<32x40xbf16>
    %c0_82 = arith.constant 0 : index
    %c0_83 = arith.constant 0 : index
    %c0_84 = arith.constant 0 : index
    %120 = vector.load %arg1[%c0_82, %c0_83, %c0_84] : memref<1x40x256xf32, #tpu.memory_space<vmem>>, vector<1x40x256xf32>
    %121 = vector.shape_cast %120 : vector<1x40x256xf32> to vector<40x256xf32>
    %122 = arith.truncf %121 : vector<40x256xf32> to vector<40x256xbf16>
    %cst_85 = arith.constant dense<0.000000e+00> : vector<32x256xf32>
    %123 = tpu.matmul %119, %122, %cst_85 {dimension_numbers = #tpu.dot_dimension_numbers<[1], [0], [0], [1], [0, 0, 1, 1], [], []>} : vector<32x40xbf16>, vector<40x256xbf16>, vector<32x256xf32> -> vector<32x256xf32>
    %c0_86 = arith.constant 0 : index
    %c0_87 = arith.constant 0 : index
    %124 = vector.load %arg7[%c0_86, %c0_87] : memref<32x1xf32, #tpu.memory_space<vmem>>, vector<32x1xf32>
    %125 = vector.broadcast %124 : vector<32x1xf32> to vector<32x256xf32>
    %126 = arith.addf %123, %125 : vector<32x256xf32>
    %127 = arith.negf %126 : vector<32x256xf32>
    %128 = math.exp %127 : vector<32x256xf32>
    %cst_88 = arith.constant 1.000000e+00 : f32
    %129 = vector.broadcast %cst_88 : f32 to vector<32x256xf32>
    %130 = arith.addf %129, %128 : vector<32x256xf32>
    %131 = arith.divf %129, %130 : vector<32x256xf32>
    %132 = arith.mulf %126, %131 : vector<32x256xf32>
    %c0_89 = arith.constant 0 : index
    %c6 = arith.constant 6 : index
    %c0_90 = arith.constant 0 : index
    %c0_91 = arith.constant 0 : index
    %133 = vector.load %arg16[%c0_89, %c6, %c0_90, %c0_91] : memref<1x12x32x32xbf16, #tpu.memory_space<vmem>>, vector<1x1x32x32xbf16>
    %134 = vector.shape_cast %133 : vector<1x1x32x32xbf16> to vector<32x32xbf16>
    %135 = arith.truncf %132 : vector<32x256xf32> to vector<32x256xbf16>
    %cst_92 = arith.constant dense<0.000000e+00> : vector<32x256xf32>
    %136 = tpu.matmul %134, %135, %cst_92 {dimension_numbers = #tpu.dot_dimension_numbers<[1], [0], [0], [1], [0, 0, 1, 1], [], []>} : vector<32x32xbf16>, vector<32x256xbf16>, vector<32x256xf32> -> vector<32x256xf32>
    %c0_93 = arith.constant 0 : index
    %c7 = arith.constant 7 : index
    %c0_94 = arith.constant 0 : index
    %c0_95 = arith.constant 0 : index
    %137 = vector.load %arg16[%c0_93, %c7, %c0_94, %c0_95] : memref<1x12x32x32xbf16, #tpu.memory_space<vmem>>, vector<1x1x32x32xbf16>
    %138 = vector.shape_cast %137 : vector<1x1x32x32xbf16> to vector<32x32xbf16>
    %139 = arith.truncf %118 : vector<32x256xf32> to vector<32x256xbf16>
    %cst_96 = arith.constant dense<0.000000e+00> : vector<32x256xf32>
    %140 = tpu.matmul %138, %139, %cst_96 {dimension_numbers = #tpu.dot_dimension_numbers<[1], [0], [0], [1], [0, 0, 1, 1], [], []>} : vector<32x32xbf16>, vector<32x256xbf16>, vector<32x256xf32> -> vector<32x256xf32>
    %141 = arith.addf %136, %140 : vector<32x256xf32>
    %c0_97 = arith.constant 0 : index
    %c3_98 = arith.constant 3 : index
    %c0_99 = arith.constant 0 : index
    %c0_100 = arith.constant 0 : index
    %142 = vector.load %arg17[%c0_97, %c3_98, %c0_99, %c0_100] : memref<1x8x32x1xf32, #tpu.memory_space<vmem>>, vector<1x1x32x1xf32>
    %143 = vector.shape_cast %142 : vector<1x1x32x1xf32> to vector<32x1xf32>
    %144 = vector.broadcast %143 : vector<32x1xf32> to vector<32x256xf32>
    %145 = arith.addf %141, %144 : vector<32x256xf32>
    %146 = arith.negf %145 : vector<32x256xf32>
    %147 = math.exp %146 : vector<32x256xf32>
    %cst_101 = arith.constant 1.000000e+00 : f32
    %148 = vector.broadcast %cst_101 : f32 to vector<32x256xf32>
    %149 = arith.addf %148, %147 : vector<32x256xf32>
    %150 = arith.divf %148, %149 : vector<32x256xf32>
    %151 = arith.mulf %145, %150 : vector<32x256xf32>
    %c0_102 = arith.constant 0 : index
    %c0_103 = arith.constant 0 : index
    %152 = vector.load %arg20[%c0_102, %c0_103] : memref<256x64xbf16, #tpu.memory_space<vmem>>, vector<256x64xbf16>
    %153 = arith.truncf %151 : vector<32x256xf32> to vector<32x256xbf16>
    %cst_104 = arith.constant dense<0.000000e+00> : vector<32x64xf32>
    %154 = tpu.matmul %153, %152, %cst_104 {dimension_numbers = #tpu.dot_dimension_numbers<[1], [0], [0], [1], [0, 0, 1, 1], [], []>} : vector<32x256xbf16>, vector<256x64xbf16>, vector<32x64xf32> -> vector<32x64xf32>
    %155 = arith.addf %96, %115 : vector<32x64xf32>
    %156 = arith.addf %155, %154 : vector<32x64xf32>
    %c0_105 = arith.constant 0 : index
    %c8 = arith.constant 8 : index
    %c0_106 = arith.constant 0 : index
    %c0_107 = arith.constant 0 : index
    %157 = vector.load %arg16[%c0_105, %c8, %c0_106, %c0_107] : memref<1x12x32x32xbf16, #tpu.memory_space<vmem>>, vector<1x1x32x32xbf16>
    %158 = vector.shape_cast %157 : vector<1x1x32x32xbf16> to vector<32x32xbf16>
    %159 = arith.truncf %156 : vector<32x64xf32> to vector<32x64xbf16>
    %cst_108 = arith.constant dense<0.000000e+00> : vector<32x64xf32>
    %160 = tpu.matmul %158, %159, %cst_108 {dimension_numbers = #tpu.dot_dimension_numbers<[1], [0], [0], [1], [0, 0, 1, 1], [], []>} : vector<32x32xbf16>, vector<32x64xbf16>, vector<32x64xf32> -> vector<32x64xf32>
    %c0_109 = arith.constant 0 : index
    %c4_110 = arith.constant 4 : index
    %c0_111 = arith.constant 0 : index
    %c0_112 = arith.constant 0 : index
    %161 = vector.load %arg17[%c0_109, %c4_110, %c0_111, %c0_112] : memref<1x8x32x1xf32, #tpu.memory_space<vmem>>, vector<1x1x32x1xf32>
    %162 = vector.shape_cast %161 : vector<1x1x32x1xf32> to vector<32x1xf32>
    %163 = vector.broadcast %162 : vector<32x1xf32> to vector<32x64xf32>
    %164 = arith.addf %160, %163 : vector<32x64xf32>
    %165 = arith.negf %164 : vector<32x64xf32>
    %166 = math.exp %165 : vector<32x64xf32>
    %cst_113 = arith.constant 1.000000e+00 : f32
    %167 = vector.broadcast %cst_113 : f32 to vector<32x64xf32>
    %168 = arith.addf %167, %166 : vector<32x64xf32>
    %169 = arith.divf %167, %168 : vector<32x64xf32>
    %170 = arith.mulf %164, %169 : vector<32x64xf32>
    %171 = arith.addf %63, %82 : vector<32x64xf32>
    %172 = arith.addf %171, %170 : vector<32x64xf32>
    %c0_114 = arith.constant 0 : index
    %c9 = arith.constant 9 : index
    %c0_115 = arith.constant 0 : index
    %c0_116 = arith.constant 0 : index
    %173 = vector.load %arg16[%c0_114, %c9, %c0_115, %c0_116] : memref<1x12x32x32xbf16, #tpu.memory_space<vmem>>, vector<1x1x32x32xbf16>
    %174 = vector.shape_cast %173 : vector<1x1x32x32xbf16> to vector<32x32xbf16>
    %175 = arith.truncf %172 : vector<32x64xf32> to vector<32x64xbf16>
    %cst_117 = arith.constant dense<0.000000e+00> : vector<32x64xf32>
    %176 = tpu.matmul %174, %175, %cst_117 {dimension_numbers = #tpu.dot_dimension_numbers<[1], [0], [0], [1], [0, 0, 1, 1], [], []>} : vector<32x32xbf16>, vector<32x64xbf16>, vector<32x64xf32> -> vector<32x64xf32>
    %c0_118 = arith.constant 0 : index
    %c5_119 = arith.constant 5 : index
    %c0_120 = arith.constant 0 : index
    %c0_121 = arith.constant 0 : index
    %177 = vector.load %arg17[%c0_118, %c5_119, %c0_120, %c0_121] : memref<1x8x32x1xf32, #tpu.memory_space<vmem>>, vector<1x1x32x1xf32>
    %178 = vector.shape_cast %177 : vector<1x1x32x1xf32> to vector<32x1xf32>
    %179 = vector.broadcast %178 : vector<32x1xf32> to vector<32x64xf32>
    %180 = arith.addf %176, %179 : vector<32x64xf32>
    %181 = arith.negf %180 : vector<32x64xf32>
    %182 = math.exp %181 : vector<32x64xf32>
    %cst_122 = arith.constant 1.000000e+00 : f32
    %183 = vector.broadcast %cst_122 : f32 to vector<32x64xf32>
    %184 = arith.addf %183, %182 : vector<32x64xf32>
    %185 = arith.divf %183, %184 : vector<32x64xf32>
    %186 = arith.mulf %180, %185 : vector<32x64xf32>
    %187 = arith.addf %13, %46 : vector<32x16xf32>
    %c0_123 = arith.constant 0 : index
    %c0_124 = arith.constant 0 : index
    %188 = vector.load %arg21[%c0_123, %c0_124] : memref<64x16xbf16, #tpu.memory_space<vmem>>, vector<64x16xbf16>
    %189 = arith.truncf %186 : vector<32x64xf32> to vector<32x64xbf16>
    %cst_125 = arith.constant dense<0.000000e+00> : vector<32x16xf32>
    %190 = tpu.matmul %189, %188, %cst_125 {dimension_numbers = #tpu.dot_dimension_numbers<[1], [0], [0], [1], [0, 0, 1, 1], [], []>} : vector<32x64xbf16>, vector<64x16xbf16>, vector<32x16xf32> -> vector<32x16xf32>
    %191 = arith.addf %187, %190 : vector<32x16xf32>
    %c0_126 = arith.constant 0 : index
    %c10 = arith.constant 10 : index
    %c0_127 = arith.constant 0 : index
    %c0_128 = arith.constant 0 : index
    %192 = vector.load %arg16[%c0_126, %c10, %c0_127, %c0_128] : memref<1x12x32x32xbf16, #tpu.memory_space<vmem>>, vector<1x1x32x32xbf16>
    %193 = vector.shape_cast %192 : vector<1x1x32x32xbf16> to vector<32x32xbf16>
    %194 = arith.truncf %191 : vector<32x16xf32> to vector<32x16xbf16>
    %cst_129 = arith.constant dense<0.000000e+00> : vector<32x16xf32>
    %195 = tpu.matmul %193, %194, %cst_129 {dimension_numbers = #tpu.dot_dimension_numbers<[1], [0], [0], [1], [0, 0, 1, 1], [], []>} : vector<32x32xbf16>, vector<32x16xbf16>, vector<32x16xf32> -> vector<32x16xf32>
    %c0_130 = arith.constant 0 : index
    %c6_131 = arith.constant 6 : index
    %c0_132 = arith.constant 0 : index
    %c0_133 = arith.constant 0 : index
    %196 = vector.load %arg17[%c0_130, %c6_131, %c0_132, %c0_133] : memref<1x8x32x1xf32, #tpu.memory_space<vmem>>, vector<1x1x32x1xf32>
    %197 = vector.shape_cast %196 : vector<1x1x32x1xf32> to vector<32x1xf32>
    %198 = vector.broadcast %197 : vector<32x1xf32> to vector<32x16xf32>
    %199 = arith.addf %195, %198 : vector<32x16xf32>
    %200 = arith.negf %199 : vector<32x16xf32>
    %201 = math.exp %200 : vector<32x16xf32>
    %cst_134 = arith.constant 1.000000e+00 : f32
    %202 = vector.broadcast %cst_134 : f32 to vector<32x16xf32>
    %203 = arith.addf %202, %201 : vector<32x16xf32>
    %204 = arith.divf %202, %203 : vector<32x16xf32>
    %205 = arith.mulf %199, %204 : vector<32x16xf32>
    %206 = arith.addf %27, %205 : vector<32x16xf32>
    %c0_135 = arith.constant 0 : index
    %c11 = arith.constant 11 : index
    %c0_136 = arith.constant 0 : index
    %c0_137 = arith.constant 0 : index
    %207 = vector.load %arg16[%c0_135, %c11, %c0_136, %c0_137] : memref<1x12x32x32xbf16, #tpu.memory_space<vmem>>, vector<1x1x32x32xbf16>
    %208 = vector.shape_cast %207 : vector<1x1x32x32xbf16> to vector<32x32xbf16>
    %209 = arith.truncf %206 : vector<32x16xf32> to vector<32x16xbf16>
    %cst_138 = arith.constant dense<0.000000e+00> : vector<32x16xf32>
    %210 = tpu.matmul %208, %209, %cst_138 {dimension_numbers = #tpu.dot_dimension_numbers<[1], [0], [0], [1], [0, 0, 1, 1], [], []>} : vector<32x32xbf16>, vector<32x16xbf16>, vector<32x16xf32> -> vector<32x16xf32>
    %c0_139 = arith.constant 0 : index
    %c7_140 = arith.constant 7 : index
    %c0_141 = arith.constant 0 : index
    %c0_142 = arith.constant 0 : index
    %211 = vector.load %arg17[%c0_139, %c7_140, %c0_141, %c0_142] : memref<1x8x32x1xf32, #tpu.memory_space<vmem>>, vector<1x1x32x1xf32>
    %212 = vector.shape_cast %211 : vector<1x1x32x1xf32> to vector<32x1xf32>
    %213 = vector.broadcast %212 : vector<32x1xf32> to vector<32x16xf32>
    %214 = arith.addf %210, %213 : vector<32x16xf32>
    %215 = arith.negf %214 : vector<32x16xf32>
    %216 = math.exp %215 : vector<32x16xf32>
    %cst_143 = arith.constant 1.000000e+00 : f32
    %217 = vector.broadcast %cst_143 : f32 to vector<32x16xf32>
    %218 = arith.addf %217, %216 : vector<32x16xf32>
    %219 = arith.divf %217, %218 : vector<32x16xf32>
    %220 = arith.mulf %214, %219 : vector<32x16xf32>
    %c0_144 = arith.constant 0 : index
    %c0_145 = arith.constant 0 : index
    %c0_146 = arith.constant 0 : index
    %221 = vector.load %arg22[%c0_144, %c0_145, %c0_146] : memref<1x32x256xf32, #tpu.memory_space<vmem>>, vector<1x32x256xf32>
    %222 = vector.shape_cast %221 : vector<1x32x256xf32> to vector<32x256xf32>
    %223 = vector.shape_cast %151 : vector<32x256xf32> to vector<1x32x256xf32>
    tpu.vector_store %arg22[%c0_144, %c0_145, %c0_146], %223 {strides = array<i32>} : memref<1x32x256xf32, #tpu.memory_space<vmem>>, vector<1x32x256xf32>,
    %c0_147 = arith.constant 0 : index
    %c0_148 = arith.constant 0 : index
    %c0_149 = arith.constant 0 : index
    %224 = vector.load %arg23[%c0_147, %c0_148, %c0_149] : memref<1x32x64xf32, #tpu.memory_space<vmem>>, vector<1x32x64xf32>
    %225 = vector.shape_cast %224 : vector<1x32x64xf32> to vector<32x64xf32>
    %226 = vector.shape_cast %170 : vector<32x64xf32> to vector<1x32x64xf32>
    tpu.vector_store %arg23[%c0_147, %c0_148, %c0_149], %226 {strides = array<i32>} : memref<1x32x64xf32, #tpu.memory_space<vmem>>, vector<1x32x64xf32>,
    %c0_150 = arith.constant 0 : index
    %c0_151 = arith.constant 0 : index
    %c0_152 = arith.constant 0 : index
    %227 = vector.load %arg24[%c0_150, %c0_151, %c0_152] : memref<1x32x64xf32, #tpu.memory_space<vmem>>, vector<1x32x64xf32>
    %228 = vector.shape_cast %227 : vector<1x32x64xf32> to vector<32x64xf32>
    %229 = vector.shape_cast %186 : vector<32x64xf32> to vector<1x32x64xf32>
    tpu.vector_store %arg24[%c0_150, %c0_151, %c0_152], %229 {strides = array<i32>} : memref<1x32x64xf32, #tpu.memory_space<vmem>>, vector<1x32x64xf32>,
    %c0_153 = arith.constant 0 : index
    %c0_154 = arith.constant 0 : index
    %c0_155 = arith.constant 0 : index
    %230 = vector.load %arg25[%c0_153, %c0_154, %c0_155] : memref<1x32x16xf32, #tpu.memory_space<vmem>>, vector<1x32x16xf32>
    %231 = vector.shape_cast %230 : vector<1x32x16xf32> to vector<32x16xf32>
    %232 = vector.shape_cast %205 : vector<32x16xf32> to vector<1x32x16xf32>
    tpu.vector_store %arg25[%c0_153, %c0_154, %c0_155], %232 {strides = array<i32>} : memref<1x32x16xf32, #tpu.memory_space<vmem>>, vector<1x32x16xf32>,
    %c0_156 = arith.constant 0 : index
    %c0_157 = arith.constant 0 : index
    %c0_158 = arith.constant 0 : index
    %233 = vector.load %arg26[%c0_156, %c0_157, %c0_158] : memref<1x32x16xf32, #tpu.memory_space<vmem>>, vector<1x32x16xf32>
    %234 = vector.shape_cast %233 : vector<1x32x16xf32> to vector<32x16xf32>
    %235 = vector.shape_cast %220 : vector<32x16xf32> to vector<1x32x16xf32>
    tpu.vector_store %arg26[%c0_156, %c0_157, %c0_158], %235 {strides = array<i32>} : memref<1x32x16xf32, #tpu.memory_space<vmem>>, vector<1x32x16xf32>,
    return
  }
  func.func @transform_0(%arg0: i32) -> (i32, i32, i32) {
    %c0_i32 = arith.constant 0 : i32
    %c0_i32_0 = arith.constant 0 : i32
    %c0_i32_1 = arith.constant 0 : i32
    return %arg0, %c0_i32, %c0_i32_0 : i32, i32, i32
  }
  func.func @transform_1(%arg0: i32) -> (i32, i32, i32) {
    %c0_i32 = arith.constant 0 : i32
    %c0_i32_0 = arith.constant 0 : i32
    %c0_i32_1 = arith.constant 0 : i32
    return %arg0, %c0_i32, %c0_i32_0 : i32, i32, i32
  }
  func.func @transform_2(%arg0: i32) -> (i32, i32, i32) {
    %c0_i32 = arith.constant 0 : i32
    %c0_i32_0 = arith.constant 0 : i32
    %c0_i32_1 = arith.constant 0 : i32
    return %arg0, %c0_i32, %c0_i32_0 : i32, i32, i32
  }
  func.func @transform_3(%arg0: i32) -> (i32, i32, i32) {
    %c0_i32 = arith.constant 0 : i32
    %c0_i32_0 = arith.constant 0 : i32
    %c0_i32_1 = arith.constant 0 : i32
    return %arg0, %c0_i32, %c0_i32_0 : i32, i32, i32
  }
  func.func @transform_4(%arg0: i32) -> (i32, i32, i32) {
    %c0_i32 = arith.constant 0 : i32
    %c0_i32_0 = arith.constant 0 : i32
    %c0_i32_1 = arith.constant 0 : i32
    return %arg0, %c0_i32, %c0_i32_0 : i32, i32, i32
  }
  func.func @transform_5(%arg0: i32) -> (i32, i32) {
    %c0_i32 = arith.constant 0 : i32
    %c0_i32_0 = arith.constant 0 : i32
    %c0_i32_1 = arith.constant 0 : i32
    return %c0_i32, %c0_i32_0 : i32, i32
  }
  func.func @transform_6(%arg0: i32) -> (i32, i32) {
    %c0_i32 = arith.constant 0 : i32
    %c0_i32_0 = arith.constant 0 : i32
    %c0_i32_1 = arith.constant 0 : i32
    return %c0_i32, %c0_i32_0 : i32, i32
  }
  func.func @transform_7(%arg0: i32) -> (i32, i32) {
    %c0_i32 = arith.constant 0 : i32
    %c0_i32_0 = arith.constant 0 : i32
    %c0_i32_1 = arith.constant 0 : i32
    return %c0_i32, %c0_i32_0 : i32, i32
  }
  func.func @transform_8(%arg0: i32) -> (i32, i32) {
    %c0_i32 = arith.constant 0 : i32
    %c0_i32_0 = arith.constant 0 : i32
    %c0_i32_1 = arith.constant 0 : i32
    return %c0_i32, %c0_i32_0 : i32, i32
  }
  func.func @transform_9(%arg0: i32) -> (i32, i32) {
    %c0_i32 = arith.constant 0 : i32
    %c0_i32_0 = arith.constant 0 : i32
    %c0_i32_1 = arith.constant 0 : i32
    return %c0_i32, %c0_i32_0 : i32, i32
  }
  func.func @transform_10(%arg0: i32) -> (i32, i32) {
    %c0_i32 = arith.constant 0 : i32
    %c0_i32_0 = arith.constant 0 : i32
    %c0_i32_1 = arith.constant 0 : i32
    return %c0_i32, %c0_i32_0 : i32, i32
  }
  func.func @transform_11(%arg0: i32) -> (i32, i32) {
    %c0_i32 = arith.constant 0 : i32
    %c0_i32_0 = arith.constant 0 : i32
    %c0_i32_1 = arith.constant 0 : i32
    return %c0_i32, %c0_i32_0 : i32, i32
  }
  func.func @transform_12(%arg0: i32) -> (i32, i32) {
    %c0_i32 = arith.constant 0 : i32
    %c0_i32_0 = arith.constant 0 : i32
    %c0_i32_1 = arith.constant 0 : i32
    return %c0_i32, %c0_i32_0 : i32, i32
  }
  func.func @transform_13(%arg0: i32) -> (i32, i32) {
    %c0_i32 = arith.constant 0 : i32
    %c0_i32_0 = arith.constant 0 : i32
    %c0_i32_1 = arith.constant 0 : i32
    return %c0_i32, %c0_i32_0 : i32, i32
  }
  func.func @transform_14(%arg0: i32) -> (i32, i32) {
    %c0_i32 = arith.constant 0 : i32
    %c0_i32_0 = arith.constant 0 : i32
    %c0_i32_1 = arith.constant 0 : i32
    return %c0_i32, %c0_i32_0 : i32, i32
  }
  func.func @transform_15(%arg0: i32) -> (i32, i32, i32, i32) {
    %c0_i32 = arith.constant 0 : i32
    %c0_i32_0 = arith.constant 0 : i32
    %c0_i32_1 = arith.constant 0 : i32
    %c0_i32_2 = arith.constant 0 : i32
    %c0_i32_3 = arith.constant 0 : i32
    return %c0_i32, %c0_i32_0, %c0_i32_1, %c0_i32_2 : i32, i32, i32, i32
  }
  func.func @transform_16(%arg0: i32) -> (i32, i32, i32, i32) {
    %c0_i32 = arith.constant 0 : i32
    %c0_i32_0 = arith.constant 0 : i32
    %c0_i32_1 = arith.constant 0 : i32
    %c0_i32_2 = arith.constant 0 : i32
    %c0_i32_3 = arith.constant 0 : i32
    return %c0_i32, %c0_i32_0, %c0_i32_1, %c0_i32_2 : i32, i32, i32, i32
  }
  func.func @transform_17(%arg0: i32) -> (i32, i32) {
    %c0_i32 = arith.constant 0 : i32
    %c0_i32_0 = arith.constant 0 : i32
    %c0_i32_1 = arith.constant 0 : i32
    return %c0_i32, %c0_i32_0 : i32, i32
  }
  func.func @transform_18(%arg0: i32) -> (i32, i32) {
    %c0_i32 = arith.constant 0 : i32
    %c0_i32_0 = arith.constant 0 : i32
    %c0_i32_1 = arith.constant 0 : i32
    return %c0_i32, %c0_i32_0 : i32, i32
  }
  func.func @transform_19(%arg0: i32) -> (i32, i32) {
    %c0_i32 = arith.constant 0 : i32
    %c0_i32_0 = arith.constant 0 : i32
    %c0_i32_1 = arith.constant 0 : i32
    return %c0_i32, %c0_i32_0 : i32, i32
  }
  func.func @transform_20(%arg0: i32) -> (i32, i32) {
    %c0_i32 = arith.constant 0 : i32
    %c0_i32_0 = arith.constant 0 : i32
    %c0_i32_1 = arith.constant 0 : i32
    return %c0_i32, %c0_i32_0 : i32, i32
  }
  func.func @transform_21(%arg0: i32) -> (i32, i32, i32) {
    %c0_i32 = arith.constant 0 : i32
    %c0_i32_0 = arith.constant 0 : i32
    %c0_i32_1 = arith.constant 0 : i32
    return %arg0, %c0_i32, %c0_i32_0 : i32, i32, i32
  }
  func.func @transform_22(%arg0: i32) -> (i32, i32, i32) {
    %c0_i32 = arith.constant 0 : i32
    %c0_i32_0 = arith.constant 0 : i32
    %c0_i32_1 = arith.constant 0 : i32
    return %arg0, %c0_i32, %c0_i32_0 : i32, i32, i32
  }
  func.func @transform_23(%arg0: i32) -> (i32, i32, i32) {
    %c0_i32 = arith.constant 0 : i32
    %c0_i32_0 = arith.constant 0 : i32
    %c0_i32_1 = arith.constant 0 : i32
    return %arg0, %c0_i32, %c0_i32_0 : i32, i32, i32
  }
  func.func @transform_24(%arg0: i32) -> (i32, i32, i32) {
    %c0_i32 = arith.constant 0 : i32
    %c0_i32_0 = arith.constant 0 : i32
    %c0_i32_1 = arith.constant 0 : i32
    return %arg0, %c0_i32, %c0_i32_0 : i32, i32, i32
  }
  func.func @transform_25(%arg0: i32) -> (i32, i32, i32) {
    %c0_i32 = arith.constant 0 : i32
    %c0_i32_0 = arith.constant 0 : i32
    %c0_i32_1 = arith.constant 0 : i32
    return %arg0, %c0_i32, %c0_i32_0 : i32, i32, i32
  }
}

</mosaic_0001>

<bundles_post_ra>
// kernel: bifpn_forward.1
= control target key start
LH: loop header
LB: loop body
LE: loop exit
PB: predicated region body
PF: predicated region fallthrough
CT: control target
= control target key end

     0   :  { %s4878_s29 = smov 0   ;;  %s5636_s0 = inlined_call_operand.vmem [shape: f32[2,40,256], index: 0, kind: input, shape index: {}]   ;;  %s5637_s1 = inlined_call_operand.vmem [shape: f32[2,80,64], index: 1, kind: input, shape index: {}]   ;;  %s5638_s2 = inlined_call_operand.vmem [shape: f32[2,112,64], index: 2, kind: input, shape index: {}]   ;;  %s5639_s3 = inlined_call_operand.vmem [shape: f32[2,192,16], index: 3, kind: input, shape index: {}]   ;;  %s5640_s4 = inlined_call_operand.vmem [shape: f32[2,320,16], index: 4, kind: input, shape index: {}]   ;;  %s5641_s5 = inlined_call_operand.vmem [shape: bf16[32,40], index: 5, kind: input, shape index: {}]   ;;  %s5642_s6 = inlined_call_operand.vmem [shape: f32[32,1], index: 6, kind: input, shape index: {}]   ;;  %s5643_s7 = inlined_call_operand.vmem [shape: bf16[32,80], index: 7, kind: input, shape index: {}]   ;;  %s5644_s8 = inlined_call_operand.vmem [shape: f32[32,1], index: 8, kind: input, shape index: {}]   ;;  %s5645_s9 = inlined_call_operand.vmem [shape: bf16[32,112], index: 9, kind: input, shape index: {}]   ;;  %s5646_s10 = inlined_call_operand.vmem [shape: f32[32,1], index: 10, kind: input, shape index: {}]   ;;  %s5647_s11 = inlined_call_operand.vmem [shape: bf16[32,192], index: 11, kind: input, shape index: {}]   ;;  %s5648_s12 = inlined_call_operand.vmem [shape: f32[32,1], index: 12, kind: input, shape index: {}]   ;;  %s5649_s13 = inlined_call_operand.vmem [shape: bf16[32,320], index: 13, kind: input, shape index: {}]   ;;  %s5650_s14 = inlined_call_operand.vmem [shape: f32[32,1], index: 14, kind: input, shape index: {}]   ;;  %s5651_s15 = inlined_call_operand.vmem [shape: bf16[1,12,32,32], index: 15, kind: input, shape index: {}]   ;;  %s5652_s16 = inlined_call_operand.vmem [shape: f32[1,8,32,1], index: 16, kind: input, shape index: {}]   ;;  %s5653_s17 = inlined_call_operand.vmem [shape: bf16[16,64], index: 17, kind: input, shape index: {}]   ;;  %s5654_s18 = inlined_call_operand.vmem [shape: bf16[64,256], index: 18, kind: input, shape index: {}]   ;;  %s5655_s19 = inlined_call_operand.vmem [shape: bf16[256,64], index: 19, kind: input, shape index: {}]   ;;  %s5656_s20 = inlined_call_operand.vmem [shape: bf16[64,16], index: 20, kind: input, shape index: {}]   ;;  %s5657_s21 = inlined_call_operand.vmem [shape: f32[2,32,256], index: 21, kind: output, shape index: {0}]   ;;  %s5658_s22 = inlined_call_operand.vmem [shape: f32[2,32,64], index: 22, kind: output, shape index: {1}]   ;;  %s5659_s23 = inlined_call_operand.vmem [shape: f32[2,32,64], index: 23, kind: output, shape index: {2}]   ;;  %s5660_s24 = inlined_call_operand.vmem [shape: f32[2,32,16], index: 24, kind: output, shape index: {3}]   ;;  %s5661_s25 = inlined_call_operand.vmem [shape: f32[2,32,16], index: 25, kind: output, shape index: {4}]  }
   0x1   :  { %5668 = sst [smem:[#allocation2_spill]] %s5636_s0 }
   0x2   :  { %5669 = sst [smem:[#allocation3_spill]] %s5637_s1 }
   0x3   :  { %5670 = sst [smem:[#allocation4_spill]] %s5638_s2 }
   0x4   :  { %5671 = sst [smem:[#allocation5_spill]] %s5639_s3 }
   0x5   :  { %5672 = sst [smem:[#allocation6_spill]] %s5640_s4 }
   0x6   :  { %5673 = sst [smem:[#allocation7_spill]] %s5641_s5 }
   0x7   :  { %5674 = sst [smem:[#allocation8_spill]] %s5642_s6 }
   0x8   :  { %5675 = sst [smem:[#allocation9_spill]] %s5643_s7 }
   0x9   :  { %5676 = sst [smem:[#allocation10_spill]] %s5644_s8 }
   0xa   :  { %5677 = sst [smem:[#allocation11_spill]] %s5645_s9 }
   0xb   :  { %5678 = sst [smem:[#allocation12_spill]] %s5650_s14 }
   0xc LB: > { %s3849_s2 = sadd.s32 4294967295, %s4745_s29   ;;  %p3853_p0 = scmp.ge.s32.totalorder %s4745_s29, 1  ;;  %s4745_s29 = sphi %s4878_s29, %s36_s29  }
   0xd   : > { %p736_p1 = scmp.lt.s32.totalorder %s4745_s29, 3 }
   0xf   : > { %p737_p2 = pnand %p3853_p0, %p736_p1 }
  0x10   : > { %p844_p3 = scmp.lt.s32.totalorder (!%p737_p2), %s3849_s2, 1  ;;  %s5679_s14 = sld [smem:[#allocation12_spill]] (!%p737_p2)  ;;  %v4747_v1 = vmov (!%p737_p2), 0   ;;  %v4424_v2 = vld [vmem:[%s5649_s13 + $0x4] ss:$12 sps:$4 sm:$0xff] (!%p737_p2)   ;;  %vm977_vm0 = vcmask (!%p737_p2), 523264  }
  0x11   : > { %740 = sbr.rel (%p737_p2) target bundleno = 3362 (0xd22), region = 104  ;;  %984 = vmatprep.subr.bf16.mxu0 (!%p737_p2), %v4747_v1  ;;  %4420 = vset.pattern.permute.xlu0 (!%p737_p2), %v4747_v1  ;;  %s5680_s30 = sld [smem:[#allocation5_spill]] (!%p737_p2)  ;;  %v935_v6 = vld [vmem:[%s5648_s12] sm:$0xff] (!%p737_p2)  ;;  %v936_v11 = vld [vmem:[%s5648_s12 + $0x8] sm:$0xff] (!%p737_p2)  ;;  %v937_v20 = vld [vmem:[%s5648_s12 + $0x10] sm:$0xff] (!%p737_p2)  ;;  %vm1338_vm1 = vcmask (!%p737_p2), 261120  }
  0x12   : > { %4421 = vset.pattern.permute.xlu1 (!%p737_p2), %v4747_v1  ;;  %1221 = vmatprep.mubr.bf16.mxu1 (!%p737_p2), %v4424_v2  ;;  %v4430_v7 = vld [vmem:[%s5647_s11 + $0x4] ss:$8 sps:$4 sm:$0xff] (!%p737_p2)   ;;  %s5681_s9 = sld [smem:[#allocation6_spill]] (!%p737_p2)  ;;  %v938_v35 = vld [vmem:[%s5648_s12 + $0x18] sm:$0xff] (!%p737_p2)  ;;  %s5683_s3 = sld [smem:[#allocation8_spill]] (!%p737_p2)  ;;  %vm1525_vm2 = vcmask (!%p737_p2), 130048  }
  0x13   : > { %3873 = vmatprep.mubr.msk.bf16.mxu0 (!%p737_p2), %vm977_vm0, %v4430_v7  ;;  %v1459_v41 = vld [vmem:[%s5652_s16] sm:$0xff] (!%p737_p2)  ;;  %s5684_s0 = sld [smem:[#allocation4_spill]] (!%p737_p2)  ;;  %s5685_s1 = sld [smem:[#allocation11_spill]] (!%p737_p2)  ;;  %vm1640_vm3 = vcmask (!%p737_p2), 916480   ;;  %vm1978_vm4 = vcmask (!%p737_p2), 654336   ;;  %vm2431_vm5 = vcmask (!%p737_p2), 1043456  }
  0x14   : > { %s5686_s8 = sld [smem:[#allocation3_spill]] (!%p737_p2)  ;;  %s5688_s6 = sld [smem:[#allocation2_spill]] (!%p737_p2)  ;;  %vm2424_vm6 = vcmask (!%p737_p2), 326656  }
  0x16   : > { %v1129_v0 = vld [vmem:[%s5679_s14] sm:$0xff] (!%p737_p2)  ;;  %v1131_v3 = vld [vmem:[%s5679_s14 + $0x10] sm:$0xff] (!%p737_p2)  ;;  %v1130_v4 = vld [vmem:[%s5679_s14 + $0x8] sm:$0xff] (!%p737_p2) }
  0x17   : > { %1135 = vperm.xlu0 (!%p737_p2), %4420, %v1129_v0   ;;  %1145 = vperm.xlu1 (!%p737_p2), %4421, %v1131_v3   ;;  %v1132_v5 = vld [vmem:[%s5679_s14 + $0x18] sm:$0xff] (!%p737_p2) }
  0x18   : > { %s5691_s2 = smov (!%p844_p3, %s3849_s2), 1 }
  0x19   : > { %s4409_s4 = smul.u32 192, %s5691_s2 }
  0x1a   : > { %s4410_s5 = smul.u32 320, %s5691_s2 }
  0x1b   : > { %s4911_s7 = scalar_lea.vmem %s5680_s30, %s4409_s4  ;;  %1140 = vperm.xlu0 %4420, %v1130_v4   ;;  %1150 = vperm.xlu1 %4421, %v1132_v5   ;;  %s5682_s30 = sld [smem:[#allocation10_spill]] }
  0x1c   : > { %s4922_s14 = scalar_lea.vmem %s5681_s9, %s4410_s5  ;;  %v899_v8 = vld [vmem:[%s4911_s7] sm:$0xff]  ;;  %v900_v9 = vld [vmem:[%s4911_s7 + $0x8] sm:$0xff]  ;;  %v901_v10 = vld [vmem:[%s4911_s7 + $0x10] sm:$0xff]  ;;  %s4408_s4 = smul.u32 112, %s5691_s2 }
  0x1d   : > { %v923_v12 = vpack.c.bf16 %v900_v9, %v899_v8  ;;  %v1085_v13 = vld [vmem:[%s4922_s14 + $0x80] sm:$0xff]  ;;  %v1086_v14 = vld [vmem:[%s4922_s14 + $0x88] sm:$0xff]  ;;  %v902_v18 = vld [vmem:[%s4911_s7 + $0x18] sm:$0xff]  ;;  %s5689_s9 = sld [smem:[#allocation7_spill]] }
  0x1e   : > { %v1069_v15 = vld [vmem:[%s4922_s14] sm:$0xff]  ;;  %v1117_v16 = vpack.c.bf16 %v1086_v14, %v1085_v13  ;;  %v1070_v17 = vld [vmem:[%s4922_s14 + $0x8] sm:$0xff]  ;;  %v1087_v19 = vld [vmem:[%s4922_s14 + $0x90] sm:$0xff]  ;;  %v924_v22 = vpack.c.bf16 %v902_v18, %v901_v10  ;;  %s5227_s5 = scalar_lea.vmem %s5684_s0, %s4408_s4 }
  0x1f   : > { %985 = vmatpush1.bf16.msra.mxu0 %v923_v12  ;;  %v1109_v21 = vpack.c.bf16 %v1070_v17, %v1069_v15  ;;  %v1088_v23 = vld [vmem:[%s4922_s14 + $0x98] sm:$0xff]  ;;  %v1071_v24 = vld [vmem:[%s4922_s14 + $0x10] sm:$0xff]  ;;  %941 = vperm.xlu0 %4420, %v935_v6   ;;  %v903_v27 = vld [vmem:[%s4911_s7 + $0x20] sm:$0xff] }
  0x20   : > { %v1072_v25 = vld [vmem:[%s4922_s14 + $0x18] sm:$0xff]  ;;  %4118 = vmatprep.subr.bf16.mxu1 %v1117_v16  ;;  %986 = vmatprep.subr.bf16.mxu0 %v4747_v1  ;;  %v1118_v26 = vpack.c.bf16 %v1088_v23, %v1087_v19  ;;  %v904_v28 = vld [vmem:[%s4911_s7 + $0x28] sm:$0xff]  ;;  %v1089_v29 = vld [vmem:[%s4922_s14 + $0xa0] sm:$0xff] }
  0x21   : > { %4119 = vmatpush3.bf16.msra.mxu1 %v1109_v21  ;;  %v1110_v30 = vpack.c.bf16 %v1072_v25, %v1071_v24  ;;  %v1090_v31 = vld [vmem:[%s4922_s14 + $0xa8] sm:$0xff]  ;;  %946 = vperm.xlu1 %4421, %v936_v11   ;;  %v1073_v33 = vld [vmem:[%s4922_s14 + $0x20] sm:$0xff]  ;;  %v925_v36 = vpack.c.bf16 %v904_v28, %v903_v27  ;;  %v1091_v37 = vld [vmem:[%s4922_s14 + $0xb0] sm:$0xff] }
  0x22   : > { %4120 = vmatprep.subr.bf16.mxu1 %v1118_v26  ;;  %v1119_v32 = vpack.c.bf16 %v1090_v31, %v1089_v29  ;;  %v1074_v34 = vld [vmem:[%s4922_s14 + $0x28] sm:$0xff]  ;;  %v1092_v38 = vld [vmem:[%s4922_s14 + $0xb8] sm:$0xff]  ;;  %v905_v39 = vld [vmem:[%s4911_s7 + $0x30] sm:$0xff] }
  0x23   : > { %987 = vmatpush1.bf16.msra.mxu0 %v924_v22  ;;  %951 = vperm.xlu0 %4420, %v937_v20   ;;  %v906_v40 = vld [vmem:[%s4911_s7 + $0x38] sm:$0xff]  ;;  %v1111_v42 = vpack.c.bf16 %v1074_v34, %v1073_v33  ;;  %v1120_v43 = vpack.c.bf16 %v1092_v38, %v1091_v37  ;;  %v1075_v44 = vld [vmem:[%s4922_s14 + $0x30] sm:$0xff]  ;;  %v1093_v47 = vld [vmem:[%s4922_s14 + $0xc0] sm:$0xff] }
  0x24   : > { %988 = vmatprep.subr.bf16.mxu0 %v4747_v1  ;;  %v1076_v45 = vld [vmem:[%s4922_s14 + $0x38] sm:$0xff]  ;;  %v926_v46 = vpack.c.bf16 %v906_v40, %v905_v39  ;;  %v1094_v48 = vld [vmem:[%s4922_s14 + $0xc8] sm:$0xff]  ;;  %v907_v49 = vld [vmem:[%s4911_s7 + $0x40] sm:$0xff] }
  0x25   : > { %4121 = vmatpush3.bf16.msra.mxu1 %v1110_v30  ;;  %956 = vperm.xlu1 %4421, %v938_v35   ;;  %v908_v50 = vld [vmem:[%s4911_s7 + $0x48] sm:$0xff]  ;;  %v1112_v51 = vpack.c.bf16 %v1076_v45, %v1075_v44  ;;  %v1121_v52 = vpack.c.bf16 %v1094_v48, %v1093_v47  ;;  %v1077_v53 = vld [vmem:[%s4922_s14 + $0x40] sm:$0xff]  ;;  %v1095_v56 = vld [vmem:[%s4922_s14 + $0xd0] sm:$0xff] }
  0x26   : > { %4122 = vmatprep.subr.bf16.mxu1 %v1119_v32  ;;  %v1078_v54 = vld [vmem:[%s4922_s14 + $0x48] sm:$0xff]  ;;  %v927_v55 = vpack.c.bf16 %v908_v50, %v907_v49  ;;  %v1096_v57 = vld [vmem:[%s4922_s14 + $0xd8] sm:$0xff]  ;;  %v909_v58 = vld [vmem:[%s4911_s7 + $0x50] sm:$0xff] }
  0x27   : > { %989 = vmatpush1.bf16.msra.mxu0 %v925_v36  ;;  %1465 = vperm.xlu0 %4420, %v1459_v41   ;;  %v910_v59 = vld [vmem:[%s4911_s7 + $0x58] sm:$0xff]  ;;  %v1113_v60 = vpack.c.bf16 %v1078_v54, %v1077_v53  ;;  %v1122_v61 = vpack.c.bf16 %v1096_v57, %v1095_v56  ;;  %v1079_v62 = vld [vmem:[%s4922_s14 + $0x50] sm:$0xff]  ;;  %v1097_v2 = vld [vmem:[%s4922_s14 + $0xe0] sm:$0xff] }
  0x28   : > { %990 = vmatprep.subr.bf16.mxu0 %v4747_v1  ;;  %v1080_v63 = vld [vmem:[%s4922_s14 + $0x58] sm:$0xff]  ;;  %v928_v0 = vpack.c.bf16 %v910_v59, %v909_v58  ;;  %v1098_v3 = vld [vmem:[%s4922_s14 + $0xe8] sm:$0xff]  ;;  %v911_v4 = vld [vmem:[%s4911_s7 + $0x60] sm:$0xff] }
  0x29   : > { %4123 = vmatpush3.bf16.msra.mxu1 %v1111_v42  ;;  %v912_v5 = vld [vmem:[%s4911_s7 + $0x68] sm:$0xff]  ;;  %v1081_v6 = vld [vmem:[%s4922_s14 + $0x60] sm:$0xff]  ;;  %v1114_v7 = vpack.c.bf16 %v1080_v63, %v1079_v62  ;;  %v1123_v9 = vpack.c.bf16 %v1098_v3, %v1097_v2  ;;  %v1099_v10 = vld [vmem:[%s4922_s14 + $0xf0] sm:$0xff] }
  0x2a   : > { %4124 = vmatprep.subr.bf16.mxu1 %v1120_v43  ;;  %v1082_v8 = vld [vmem:[%s4922_s14 + $0x68] sm:$0xff]  ;;  %v929_v11 = vpack.c.bf16 %v912_v5, %v911_v4  ;;  %v1100_v12 = vld [vmem:[%s4922_s14 + $0xf8] sm:$0xff]  ;;  %v1461_v14 = vld [vmem:[%s5652_s16 + $0x10] sm:$0xff] }
  0x2b   : > { %991 = vmatpush1.bf16.msra.mxu0 %v926_v46  ;;  %v1460_v13 = vld [vmem:[%s5652_s16 + $0x8] sm:$0xff]  ;;  %v913_v15 = vld [vmem:[%s4911_s7 + $0x70] sm:$0xff]  ;;  %v914_v16 = vld [vmem:[%s4911_s7 + $0x78] sm:$0xff]  ;;  %v1115_v17 = vpack.c.bf16 %v1082_v8, %v1081_v6  ;;  %1475 = vperm.xlu0 %4420, %v1461_v14   ;;  %v1124_v19 = vpack.c.bf16 %v1100_v12, %v1099_v10 }
  0x2c   : > { %992 = vmatprep.subr.bf16.mxu0 %v4747_v1  ;;  %1470 = vperm.xlu1 %4421, %v1460_v13   ;;  %v1462_v18 = vld [vmem:[%s5652_s16 + $0x18] sm:$0xff]  ;;  %v1083_v20 = vld [vmem:[%s4922_s14 + $0x70] sm:$0xff]  ;;  %v1606_v22 = vld [vmem:[%s5646_s10] sm:$0xff]  ;;  %v930_v23 = vpack.c.bf16 %v914_v16, %v913_v15 }
  0x2d   : > { %4125 = vmatpush3.bf16.msra.mxu1 %v1112_v51  ;;  %v1084_v21 = vld [vmem:[%s4922_s14 + $0x78] sm:$0xff]  ;;  %v1101_v24 = vld [vmem:[%s4922_s14 + $0x100] sm:$0xff]  ;;  %v1102_v25 = vld [vmem:[%s4922_s14 + $0x108] sm:$0xff] }
  0x2e   : > { %4126 = vmatprep.subr.bf16.mxu1 %v1121_v52  ;;  %v915_v26 = vld [vmem:[%s4911_s7 + $0x80] sm:$0xff]  ;;  %v916_v27 = vld [vmem:[%s4911_s7 + $0x88] sm:$0xff]  ;;  %v1116_v28 = vpack.c.bf16 %v1084_v21, %v1083_v20  ;;  %v1125_v30 = vpack.c.bf16 %v1102_v25, %v1101_v24  ;;  %v1608_v31 = vld [vmem:[%s5646_s10 + $0x10] sm:$0xff] }
  0x2f   : > { %993 = vmatpush1.bf16.msra.mxu0 %v927_v55  ;;  %1612 = vperm.xlu0 %4420, %v1606_v22   ;;  %v1607_v29 = vld [vmem:[%s5646_s10 + $0x8] sm:$0xff]  ;;  %v931_v32 = vpack.c.bf16 %v916_v27, %v915_v26  ;;  %v1103_v33 = vld [vmem:[%s4922_s14 + $0x110] sm:$0xff]  ;;  %v1104_v34 = vld [vmem:[%s4922_s14 + $0x118] sm:$0xff] }
  0x30   : > { %994 = vmatprep.subr.bf16.mxu0 %v4747_v1  ;;  %1480 = vperm.xlu1 %4421, %v1462_v18   ;;  %v4422_v35 = vld [vmem:[%s5649_s13] ss:$12 sps:$4 sm:$0xff]   ;;  %v917_v36 = vld [vmem:[%s4911_s7 + $0x90] sm:$0xff]  ;;  %v918_v37 = vld [vmem:[%s4911_s7 + $0x98] sm:$0xff]  ;;  %v1126_v39 = vpack.c.bf16 %v1104_v34, %v1103_v33 }
  0x31   : > { %4127 = vmatpush3.bf16.msra.mxu1 %v1113_v60  ;;  %v4425_v38 = vld [vmem:[%s5649_s13 + $0x1c] ss:$12 sps:$4 sm:$0xff]   ;;  %v932_v40 = vpack.c.bf16 %v918_v37, %v917_v36  ;;  %v1105_v41 = vld [vmem:[%s4922_s14 + $0x120] sm:$0xff]  ;;  %v1107_v47 = vld [vmem:[%s4922_s14 + $0x130] sm:$0xff] }
  0x32   : > { %4128 = vmatprep.subr.bf16.mxu1 %v1122_v61  ;;  %v1106_v42 = vld [vmem:[%s4922_s14 + $0x128] sm:$0xff]  ;;  %v1609_v43 = vld [vmem:[%s5646_s10 + $0x18] sm:$0xff]  ;;  %v919_v44 = vld [vmem:[%s4911_s7 + $0xa0] sm:$0xff] }
  0x33   : > { %995 = vmatpush1.bf16.msra.mxu0 %v928_v0  ;;  %1622 = vperm.xlu0 %4420, %v1608_v31   ;;  %v920_v45 = vld [vmem:[%s4911_s7 + $0xa8] sm:$0xff]  ;;  %v1944_v46 = vld [vmem:[%s5682_s30] sm:$0xff]  ;;  %v1127_v49 = vpack.c.bf16 %v1106_v42, %v1105_v41  ;;  %v921_v50 = vld [vmem:[%s4911_s7 + $0xb0] sm:$0xff] }
  0x34   : > { %996 = vmatprep.subr.bf16.mxu0 %v4747_v1  ;;  %1617 = vperm.xlu1 %4421, %v1607_v29   ;;  %v4427_v48 = vld [vmem:[%s5649_s13 + $0x18] ss:$12 sps:$4 sm:$0xff]   ;;  %v1945_v53 = vld [vmem:[%s5682_s30 + $0x8] sm:$0xff]  ;;  %v1946_v54 = vld [vmem:[%s5682_s30 + $0x10] sm:$0xff]  ;;  %v933_v55 = vpack.c.bf16 %v920_v45, %v919_v44 }
  0x35   : > { %4129 = vmatpush3.bf16.msra.mxu1 %v1114_v7  ;;  %v922_v51 = vld [vmem:[%s4911_s7 + $0xb8] sm:$0xff]  ;;  %v4431_v56 = vld [vmem:[%s5649_s13 + $0x8] ss:$12 sps:$4 sm:$0xff]   ;;  %v3966_v59 = vld [vmem:[%s5652_s16 + $0x40] sm:$0xff]  ;;  %s5687_s7 = sld [smem:[#allocation9_spill]] }
  0x36   : > { %4130 = vmatprep.subr.bf16.mxu1 %v1123_v9  ;;  %v1108_v52 = vld [vmem:[%s4922_s14 + $0x138] sm:$0xff]  ;;  %v934_v60 = vpack.c.bf16 %v922_v51, %v921_v50  ;;  %v4428_v61 = vld [vmem:[%s5647_s11] ss:$8 sps:$4 sm:$0xff]   ;;  %v3968_v2 = vld [vmem:[%s5652_s16 + $0x50] sm:$0xff] }
  0x37   : > { %997 = vmatpush1.bf16.msra.mxu0 %v929_v11  ;;  %1950 = vperm.xlu0 %4420, %v1944_v46   ;;  %v1947_v57 = vld [vmem:[%s5682_s30 + $0x18] sm:$0xff]  ;;  %v1128_v58 = vpack.c.bf16 %v1108_v52, %v1107_v47  ;;  %v3967_v63 = vld [vmem:[%s5652_s16 + $0x48] sm:$0xff]  ;;  %v2390_v4 = vld [vmem:[%s5683_s3] sm:$0xff] }
  0x38   : > { %998 = vmatprep.subr.bf16.mxu0 %v4747_v1  ;;  %1627 = vperm.xlu1 %4421, %v1609_v43   ;;  %v4433_v62 = vld [vmem:[%s5647_s11 + $0x14] ss:$8 sps:$4 sm:$0xff]   ;;  %v4432_v0 = vld [vmem:[%s5649_s13 + $0x20] ss:$12 sps:$4 sm:$0xff]   ;;  %v4435_v5 = vld [vmem:[%s5647_s11 + $0x10] ss:$8 sps:$4 sm:$0xff]  }
  0x39   : > { %4131 = vmatpush3.bf16.msra.mxu1 %v1115_v17  ;;  %v3969_v3 = vld [vmem:[%s5652_s16 + $0x58] sm:$0xff]  ;;  %v2391_v6 = vld [vmem:[%s5683_s3 + $0x8] sm:$0xff]  ;;  %v2392_v7 = vld [vmem:[%s5683_s3 + $0x10] sm:$0xff] }
  0x3a   : > { %4132 = vmatprep.subr.bf16.mxu1 %v1124_v19  ;;  %v2393_v8 = vld [vmem:[%s5683_s3 + $0x18] sm:$0xff]  ;;  %v4013_v9 = vld [vmem:[%s5652_s16 + $0x60] sm:$0xff]  ;;  %v4014_v10 = vld [vmem:[%s5652_s16 + $0x68] sm:$0xff] }
  0x3b   : > { %999 = vmatpush1.bf16.msra.mxu0 %v930_v23  ;;  %1960 = vperm.xlu0 %4420, %v1946_v54   ;;  %v4015_v11 = vld [vmem:[%s5652_s16 + $0x70] sm:$0xff]  ;;  %v4016_v12 = vld [vmem:[%s5652_s16 + $0x78] sm:$0xff]  ;;  %v3934_v13 = vld [vmem:[%s5652_s16 + $0x20] sm:$0xff] }
  0x3c   : > { %1000 = vmatprep.subr.bf16.mxu0 %v4747_v1  ;;  %1955 = vperm.xlu1 %4421, %v1945_v53   ;;  %v3935_v14 = vld [vmem:[%s5652_s16 + $0x28] sm:$0xff]  ;;  %v4045_v15 = vld [vmem:[%s5652_s16 + $0x80] sm:$0xff]  ;;  %v3936_v17 = vld [vmem:[%s5652_s16 + $0x30] sm:$0xff] }
  0x3d   : > { %4133 = vmatpush3.bf16.msra.mxu1 %v1116_v28  ;;  %v4046_v16 = vld [vmem:[%s5652_s16 + $0x88] sm:$0xff]  ;;  %v3937_v18 = vld [vmem:[%s5652_s16 + $0x38] sm:$0xff]  ;;  %v4047_v19 = vld [vmem:[%s5652_s16 + $0x90] sm:$0xff] }
  0x3e   : > { %4245 = vmatprep.subr.bf16.mxu1 %v1125_v30  ;;  %v4048_v20 = vld [vmem:[%s5652_s16 + $0x98] sm:$0xff]  ;;  %v4061_v21 = vld [vmem:[%s5652_s16 + $0xa0] sm:$0xff]  ;;  %v4062_v22 = vld [vmem:[%s5652_s16 + $0xa8] sm:$0xff] }
  0x3f   : > { %1001 = vmatpush1.bf16.msra.mxu0 %v931_v32  ;;  %2211 = vperm.xlu0 %4420, %v3966_v59   ;;  %v4063_v23 = vld [vmem:[%s5652_s16 + $0xb0] sm:$0xff]  ;;  %v4064_v24 = vld [vmem:[%s5652_s16 + $0xb8] sm:$0xff]  ;;  %v4083_v25 = vld [vmem:[%s5652_s16 + $0xc0] sm:$0xff] }
  0x40   : > { %1222 = vmatmul.mubr.bf16.vlgmr.msra.gmra.mrb[0].mxu1 %v4422_v35  ;;  %1002 = vmatprep.subr.bf16.mxu0 %v4747_v1  ;;  %v4084_v26 = vld [vmem:[%s5652_s16 + $0xc8] sm:$0xff]  ;;  %v4085_v27 = vld [vmem:[%s5652_s16 + $0xd0] sm:$0xff]  ;;  %v4086_v28 = vld [vmem:[%s5652_s16 + $0xd8] sm:$0xff] }
  0x41   : > { %4246 = vmatpush3.bf16.msra.mxu1 %v1125_v30  ;;  %1229 = vmatprep.mubr.bf16.mxu1 %v4425_v38  ;;  %v4099_v29 = vld [vmem:[%s5652_s16 + $0xe0] sm:$0xff]  ;;  %v4100_v30 = vld [vmem:[%s5652_s16 + $0xe8] sm:$0xff]  ;;  %v4101_v31 = vld [vmem:[%s5652_s16 + $0xf0] sm:$0xff] }
  0x42   : > { %4247 = vmatprep.subr.bf16.mxu1 %v1126_v39  ;;  %1965 = vperm.xlu1 %4421, %v1947_v57   ;;  %v4102_v32 = vld [vmem:[%s5652_s16 + $0xf8] sm:$0xff]  ;;  %v4436_v33 = vld [vmem:[%s5651_s15 + $0x10] sm:$0xff]  }
  0x43   : > { %1003 = vmatpush1.bf16.msra.mxu0 %v932_v40  ;;  %2221 = vperm.xlu0 %4420, %v3968_v2  }
  0x44   : > { %1004 = vmatprep.subr.bf16.mxu0 %v4747_v1 }
  0x45   : > { %4248 = vmatpush3.bf16.msra.mxu1 %v1126_v39 }
  0x46   : > { %4249 = vmatprep.subr.bf16.mxu1 %v1127_v49  ;;  %2216 = vperm.xlu1 %4421, %v3967_v63  }
  0x47   : > { %1005 = vmatpush1.bf16.msra.mxu0 %v933_v55  ;;  %2396 = vperm.xlu0 %4420, %v2390_v4  }
  0x48   : > { %1230 = vmatmul.mubr.bf16.gmra.mrb[4].mxu1 %v4427_v48  ;;  %1006 = vmatprep.subr.bf16.mxu0 %v4747_v1 }
  0x49   : > { %4250 = vmatpush3.bf16.msra.mxu1 %v1127_v49  ;;  %4253 = vmatprep.mubr.msk.bf16.mxu1 %vm977_vm0, %v4431_v56 }
  0x4a   : > { %4251 = vmatprep.subr.bf16.mxu1 %v1128_v58  ;;  %2226 = vperm.xlu1 %4421, %v3969_v3  }
  0x4b   : > { %1007 = vmatpush1.bf16.msra.mxu0 %v934_v60  ;;  %2406 = vperm.xlu0 %4420, %v2392_v7  }
  0x4d   : > { %4252 = vmatpush3.bf16.msra.mxu1 %v1128_v58 }
  0x4e   : > { %1017 = vmatmul.mubr.bf16.vlgmr.msra.gmra.mrb[0].mxu0 %v4428_v61  ;;  %2401 = vperm.xlu1 %4421, %v2391_v6  }
  0x4f   : > { %3874 = vmatprep.mubr.msk.bf16.mxu0 %vm977_vm0, %v4433_v62  ;;  %2710 = vperm.xlu0 %4420, %v4013_v9  }
  0x50   : > { %4254 = vmatmul.mubr.msk.bf16.vlgmr.msra.gmra.mrb[8].mxu1 %vm977_vm0, %v4432_v0 }
  0x51   : > { %4261 = vmatprep.mubr.msk.bf16.mxu1 %vm1338_vm1, %v4436_v33 }
  0x52   : > { %2411 = vperm.xlu1 %4421, %v2393_v8  }
  0x53   : > { %2720 = vperm.xlu0 %4420, %v4015_v11  }
  0x56   : > { %1025 = vmatmul.mubr.bf16.gmra.mrb[4].mxu0 %v4435_v5  ;;  %2715 = vperm.xlu1 %4421, %v4014_v10  }
  0x57   : > { %1875 = vperm.xlu0 %4420, %v3934_v13  }
  0x5a   : > { %2725 = vperm.xlu1 %4421, %v4016_v12  }
  0x5b   : > { %2995 = vperm.xlu0 %4420, %v4045_v15  }
  0x5e   : > { %1880 = vperm.xlu1 %4421, %v3935_v14  }
  0x5f   : > { %1885 = vperm.xlu0 %4420, %v3936_v17  }
  0x62   : > { %3000 = vperm.xlu1 %4421, %v4046_v16  }
  0x63   : > { %3005 = vperm.xlu0 %4420, %v4047_v19  }
  0x66   : > { %1890 = vperm.xlu1 %4421, %v3937_v18  }
  0x67   : > { %3128 = vperm.xlu0 %4420, %v4061_v21  }
  0x6a   : > { %3010 = vperm.xlu1 %4421, %v4048_v20  }
  0x6b   : > { %3138 = vperm.xlu0 %4420, %v4063_v23  }
  0x6e   : > { %3133 = vperm.xlu1 %4421, %v4062_v22  }
  0x6f   : > { %3350 = vperm.xlu0 %4420, %v4083_v25  }
  0x72   : > { %3143 = vperm.xlu1 %4421, %v4064_v24  }
  0x73   : > { %3360 = vperm.xlu0 %4420, %v4085_v27  }
  0x76   : > { %3355 = vperm.xlu1 %4421, %v4084_v26  }
  0x77   : > { %3479 = vperm.xlu0 %4420, %v4099_v29  }
  0x7a   : > { %3365 = vperm.xlu1 %4421, %v4086_v28  }
  0x7b   : > { %3489 = vperm.xlu0 %4420, %v4101_v31  }
  0x7e   : > { %3484 = vperm.xlu1 %4421, %v4100_v30  }
  0x82   : > { %3494 = vperm.xlu1 %4421, %v4102_v32  }
  0x96   : > { %v1136_v36 = vpop.permute.xlu0 %1135  ;;  %v1146_v39 = vpop.permute.xlu1 %1145 }
  0x9a   : > { %v1141_v42 = vpop.permute.xlu0 %1140  ;;  %v1151_v44 = vpop.permute.xlu1 %1150 }
  0x9e   : > { %v942_v50 = vpop.permute.xlu0 %941 }
  0xa0   : > { %v947_v52 = vpop.permute.xlu1 %946 }
  0xa2   : > { %v952_v12 = vpop.permute.xlu0 %951 }
  0xa4   : > { %v957_v17 = vpop.permute.xlu1 %956 }
 0x113   : > { %v4134_v34 = vpop.f32.mrb[0].mxu1 }
 0x114   : > { %v4135_v35 = vpop.f32.mrb[1].mxu1 }
 0x115   : > { %v4136_v37 = vadd.f32 %v4135_v35, %v4134_v34  ;;  %v4137_v38 = vpop.f32.mrb[2].mxu1 }
 0x116   : > { %v4138_v40 = vpop.f32.mrb[3].mxu1 }
 0x117   : > { %v4139_v41 = vadd.f32 %v4138_v40, %v4137_v38  ;;  %v1224_v58 = vadd.f32 %v4136_v37, %v1136_v36 }
 0x119   : > { %v1227_v4 = vadd.f32 %v4139_v41, %v1141_v42 }
 0x11b   : > { %v4140_v43 = vpop.f32.mrb[4].mxu1 }
 0x11c   : > { %v4141_v45 = vpop.f32.mrb[5].mxu1 }
 0x11d   : > { %v4142_v46 = vadd.f32 %v4141_v45, %v4140_v43  ;;  %v4143_v47 = vpop.f32.mrb[6].mxu1 }
 0x11e   : > { %v4144_v48 = vpop.f32.mrb[7].mxu1 }
 0x11f   : > { %v4145_v49 = vadd.f32 %v4144_v48, %v4143_v47  ;;  %v1232_v55 = vadd.f32 %v4142_v46, %v1146_v39 }
 0x121   : > { %v1018_v51 = vpop.f32.mrb[0].mxu0  ;;  %v1235_v63 = vadd.f32 %v4145_v49, %v1151_v44 }
 0x122   : > { %v5172_v53 = vadd.f32 %v1018_v51, %v942_v50  ;;  %v1020_v54 = vpop.f32.mrb[1].mxu0 }
 0x123   : > { %v4255_v56 = vpop.f32.mrb[8].mxu1  ;;  %v1021_v57 = vpop.f32.mrb[2].mxu0 }
 0x124   : > { %v3875_v59 = vmul.f32 -1.442695, %v5172_v53  ;;  %v5175_v60 = vadd.f32 %v4255_v56, %v1232_v55  ;;  %v5177_v61 = vadd.f32 %v1021_v57, %v947_v52  ;;  %v1272_v62 = vpop.f32.mrb[9].mxu1  ;;  %v1023_v0 = vpop.f32.mrb[3].mxu0 }
 0x125   : > { %v1273_v2 = vadd.f32 %v1272_v62, %v1224_v58  ;;  %v4256_v3 = vpop.f32.mrb[10].mxu1  ;;  %v4437_v58 = vld [vmem:[%s5651_s15 + $0x18] sm:$0xff]   ;;  %v4440_v62 = vld [vmem:[%s5653_s17] sm:$0xff]   ;;  %v1586_v0 = vld [vmem:[%s5227_s5 + $0x8] sm:$0xff] }
 0x126   : > { %v3889_v5 = vmul.f32 -1.442695, %v5175_v60  ;;  %v3876_v6 = vmul.f32 -1.442695, %v5177_v61  ;;  %v1284_v7 = vadd.f32 %v4256_v3, %v1235_v63  ;;  %v1275_v8 = vpop.f32.mrb[11].mxu1  ;;  %4499 = vpow2.f32 %v3875_v59  ;;  %v4438_v59 = vld [vmem:[%s5651_s15] sm:$0xff]   ;;  %4273 = vmatprep.subr.bf16.mxu0 %v4440_v62  ;;  %v1466_v3 = vpop.permute.xlu0 %1465 }
 0x127   : > { %v3887_v9 = vmul.f32 -1.442695, %v1273_v2  ;;  %v1276_v10 = vadd.f32 %v1275_v8, %v1227_v4  ;;  %4274 = vmatpush3.bf16.msra.mxu0 %v4440_v62  ;;  %v1585_v63 = vld [vmem:[%s5227_s5] sm:$0xff]  ;;  %v1471_v4 = vpop.permute.xlu1 %1470  ;;  %v1598_v62 = vld [vmem:[%s5227_s5 + $0x68] sm:$0xff] }
 0x128   : > { %4501 = vpow2.f32 %v3889_v5  ;;  %v3890_v11 = vmul.f32 -1.442695, %v1284_v7 }
 0x129   : > { %4503 = vpow2.f32 %v3876_v6  ;;  %v3888_v13 = vmul.f32 -1.442695, %v1276_v10  ;;  %v1026_v14 = vpop.f32.mrb[4].mxu0 }
 0x12a   : > { %4505 = vpow2.f32 %v3887_v9  ;;  %v1027_v15 = vadd.f32 %v1026_v14, %v952_v12  ;;  %v1028_v16 = vpop.f32.mrb[5].mxu0  ;;  %v1476_v5 = vpop.permute.xlu0 %1475 }
 0x12b   : > { %4507 = vpow2.f32 %v3890_v11  ;;  %v1029_v18 = vpop.f32.mrb[6].mxu0  ;;  %v1481_v9 = vpop.permute.xlu1 %1480 }
 0x12c   : > { %4509 = vpow2.f32 %v3888_v13  ;;  %v3877_v19 = vmul.f32 -1.442695, %v1027_v15  ;;  %v1030_v20 = vadd.f32 %v1029_v18, %v957_v17  ;;  %v1031_v21 = vpop.f32.mrb[7].mxu0 }
 0x12e   : > { %v3878_v22 = vmul.f32 -1.442695, %v1030_v20  ;;  %4511 = vpow2.f32 %v3877_v19 }
 0x130   : > { %4513 = vpow2.f32 %v3878_v22  ;;  %v4500_v23 = vpop.eup %4499 }
 0x131   : > { %v1045_v35 = vadd.f32 1.0, %v4500_v23 }
 0x132   : > { %v4502_v24 = vpop.eup %4501 }
 0x133   : > { %v4504_v25 = vpop.eup %4503  ;;  %v1301_v26 = vadd.f32 1.0, %v4502_v24 }
 0x134   : > { %v4506_v27 = vpop.eup %4505  ;;  %v1046_v32 = vadd.f32 1.0, %v4504_v25 }
 0x135   : > { %v4508_v28 = vpop.eup %4507  ;;  %v1299_v29 = vadd.f32 1.0, %v4506_v27  ;;  %4515 = vrcp.f32 %v1301_v26 }
 0x136   : > { %v4510_v30 = vpop.eup %4509  ;;  %v1302_v31 = vadd.f32 1.0, %v4508_v28 }
 0x137   : > { %4517 = vrcp.f32 %v1299_v29  ;;  %v1300_v33 = vadd.f32 1.0, %v4510_v30 }
 0x138   : > { %4519 = vrcp.f32 %v1302_v31  ;;  %v4512_v34 = vpop.eup %4511 }
 0x139   : > { %4521 = vrcp.f32 %v1300_v33  ;;  %v1047_v38 = vadd.f32 1.0, %v4512_v34 }
 0x13a   : > { %v4514_v36 = vpop.eup %4513  ;;  %4523 = vrcp.f32 %v1046_v32 }
 0x13b   : > { %v1048_v37 = vadd.f32 1.0, %v4514_v36  ;;  %4525 = vrcp.f32 %v1045_v35  ;;  %v1587_v35 = vld [vmem:[%s5227_s5 + $0x10] sm:$0xff]  ;;  %v1588_v36 = vld [vmem:[%s5227_s5 + $0x18] sm:$0xff] }
 0x13d   : > { %4527 = vrcp.f32 %v1048_v37 }
 0x13e   : > { %4529 = vrcp.f32 %v1047_v38 }
 0x13f   : > { %v4516_v39 = vpop.eup %4515 }
 0x140   : > { %v5188_v47 = vmul.f32 %v4516_v39, %v5175_v60  ;;  %v4441_v39 = vld [vmem:[%s5685_s1] sm:$0xff]  }
 0x141   : > { %v4518_v40 = vpop.eup %4517 }
 0x142   : > { %v4520_v41 = vpop.eup %4519  ;;  %v5181_v43 = vmul.f32 %v4518_v40, %v1273_v2  ;;  %v1599_v2 = vpack.c.bf16 %v1586_v0, %v1585_v63  ;;  %v1600_v40 = vpack.c.bf16 %v1588_v36, %v1587_v35  ;;  %v4442_v0 = vld [vmem:[%s5685_s1 + $0x8] sm:$0xff]   ;;  %s4113_s1 = sshll.u32 %s5691_s2, 6 }
 0x143   : > { %v4522_v42 = vpop.eup %4521  ;;  %v5183_v44 = vmul.f32 %v4520_v41, %v1284_v7  ;;  %v1589_v41 = vld [vmem:[%s5227_s5 + $0x20] sm:$0xff]  ;;  %s873_s14 = scalar_lea.vmem %s5657_s21, %s4113_s1  ;;  %s5549_s1 = sshll.u32 %s5691_s2, 5 }
 0x144   : > { %v5185_v45 = vmul.f32 %v4522_v42, %v1276_v10  ;;  %v4524_v46 = vpop.eup %4523  ;;  %4279 = vmatprep.subr.bf16.mxu0 %v1599_v2  ;;  %v1590_v42 = vld [vmem:[%s5227_s5 + $0x28] sm:$0xff]  ;;  %s888_s0 = scalar_lea.vmem %s5660_s24, %s5549_s1  ;;  %s893_s28 = scalar_lea.vmem %s5661_s25, %s5549_s1 }
 0x145   : > { %v4526_v49 = vpop.eup %4525  ;;  %v5193_v50 = vmul.f32 %v4524_v46, %v5177_v61  ;;  %v1327_v51 = vpack.c.bf16 %v5183_v44, %v5188_v47  ;;  %v4439_v61 = vld [vmem:[%s5651_s15 + $0x8] sm:$0xff]   ;;  %v1601_v46 = vpack.c.bf16 %v1590_v42, %v1589_v41 }
 0x146   : > { %v1326_v48 = vpack.c.bf16 %v5185_v45, %v5181_v43  ;;  %v5198_v54 = vmul.f32 %v4526_v49, %v5172_v53  ;;  %v1592_v49 = vld [vmem:[%s5227_s5 + $0x38] sm:$0xff] }
 0x147   : > { %v4528_v52 = vpop.eup %4527 }
 0x148   : > { %4257 = vmatprep.subr.bf16.mxu1 %v1326_v48  ;;  %v4530_v55 = vpop.eup %4529  ;;  %v5200_v56 = vmul.f32 %v4528_v52, %v1030_v20  ;;  %v1319_v57 = vpack.c.bf16 %v5193_v50, %v5198_v54  ;;  %v1593_v52 = vld [vmem:[%s5227_s5 + $0x40] sm:$0xff] }
 0x149   : > { %4258 = vmatpush3.bf16.msra.mxu1 %v1326_v48  ;;  %v5210_v60 = vmul.f32 %v4530_v55, %v1027_v15  ;;  %v1591_v48 = vld [vmem:[%s5227_s5 + $0x30] sm:$0xff]  ;;  %v1594_v55 = vld [vmem:[%s5227_s5 + $0x48] sm:$0xff] }
 0x14a   : > { %4259 = vmatprep.subr.bf16.mxu1 %v1327_v51 }
 0x14b   : > { %v1320_v53 = vpack.c.bf16 %v5200_v56, %v5210_v60 }
 0x14d   : > { %4260 = vmatpush3.bf16.msra.mxu1 %v1327_v51  ;;  %v1602_v51 = vpack.c.bf16 %v1592_v49, %v1591_v48 }
 0x14e   : > { %4265 = vmatprep.subr.bf16.mxu1 %v1319_v57 }
 0x150   : > { %4262 = vmatmul.mubr.msk.bf16.vlgmr.msra.gmra.mrb[12].mxu1 %vm1338_vm1, %v4437_v58  ;;  %v1595_v58 = vld [vmem:[%s5227_s5 + $0x50] sm:$0xff] }
 0x151   : > { %4266 = vmatpush3.bf16.msra.mxu1 %v1319_v57  ;;  %4269 = vmatprep.mubr.msk.bf16.mxu1 %vm1338_vm1, %v4438_v59  ;;  %v1603_v57 = vpack.c.bf16 %v1594_v55, %v1593_v52  ;;  %v1596_v59 = vld [vmem:[%s5227_s5 + $0x58] sm:$0xff] }
 0x152   : > { %4267 = vmatprep.subr.bf16.mxu1 %v1320_v53 }
 0x155   : > { %4268 = vmatpush3.bf16.msra.mxu1 %v1320_v53  ;;  %v1604_v53 = vpack.c.bf16 %v1596_v59, %v1595_v58 }
 0x15c   : > { %4270 = vmatmul.mubr.msk.bf16.vlgmr.msra.gmra.mrb[12].mxu1 %vm1338_vm1, %v4439_v61  ;;  %v1597_v61 = vld [vmem:[%s5227_s5 + $0x60] sm:$0xff]  ;;  %s4407_s5 = smul.u32 80, %s5691_s2 }
 0x15d   : > { %v1605_v63 = vpack.c.bf16 %v1598_v62, %v1597_v61  ;;  %v4446_v62 = vld [vmem:[%s5651_s15 + $0x28] sm:$0xff]  }
 0x15e   : > { %s5289_s27 = scalar_lea.vmem %s5686_s8, %s4407_s5  ;;  %s848_s26 = scalar_lea.vmem %s5688_s6, %s4407_s5 }
 0x15f   : > { %v1929_v55 = vld [vmem:[%s5289_s27] sm:$0xff]  ;;  %v1932_v61 = vld [vmem:[%s5289_s27 + $0x18] sm:$0xff]  ;;  %s883_s6 = scalar_lea.vmem %s5659_s23, %s5549_s1 }
 0x22f   : > { %v4271_v6 = vpop.f32.mrb[12].mxu1 }
 0x230   : > { %v1485_v7 = vadd.f32 %v4271_v6, %v1476_v5  ;;  %v1444_v8 = vpop.f32.mrb[13].mxu1 }
 0x231   : > { %v1483_v10 = vadd.f32 %v1466_v3, %v1444_v8  ;;  %v4272_v11 = vpop.f32.mrb[14].mxu1 }
 0x232   : > { %v3905_v12 = vmul.f32 -1.442695, %v1485_v7  ;;  %v1486_v13 = vadd.f32 %v4272_v11, %v1481_v9  ;;  %v1447_v14 = vpop.f32.mrb[15].mxu1  ;;  %v4444_v9 = vld [vmem:[%s5651_s15 + $0x38] sm:$0xff]   ;;  %v1613_v11 = vpop.permute.xlu0 %1612 }
 0x233   : > { %v3903_v15 = vmul.f32 -1.442695, %v1483_v10  ;;  %v1484_v16 = vadd.f32 %v1471_v4, %v1447_v14 }
 0x234   : > { %4531 = vpow2.f32 %v3905_v12  ;;  %v3906_v17 = vmul.f32 -1.442695, %v1486_v13  ;;  %v1618_v12 = vpop.permute.xlu1 %1617 }
 0x235   : > { %4533 = vpow2.f32 %v3903_v15  ;;  %v3904_v18 = vmul.f32 -1.442695, %v1484_v16 }
 0x236   : > { %4535 = vpow2.f32 %v3906_v17 }
 0x237   : > { %4537 = vpow2.f32 %v3904_v18 }
 0x238   : > { %v1628_v17 = vpop.permute.xlu1 %1627 }
 0x23e   : > { %v4532_v19 = vpop.eup %4531 }
 0x23f   : > { %v4534_v20 = vpop.eup %4533  ;;  %v1501_v21 = vadd.f32 1.0, %v4532_v19 }
 0x240   : > { %v4536_v22 = vpop.eup %4535  ;;  %v1499_v23 = vadd.f32 1.0, %v4534_v20 }
 0x241   : > { %v4538_v24 = vpop.eup %4537  ;;  %4539 = vrcp.f32 %v1501_v21  ;;  %v1502_v25 = vadd.f32 1.0, %v4536_v22 }
 0x242   : > { %4541 = vrcp.f32 %v1499_v23  ;;  %v1500_v26 = vadd.f32 1.0, %v4538_v24 }
 0x243   : > { %4543 = vrcp.f32 %v1502_v25 }
 0x244   : > { %4545 = vrcp.f32 %v1500_v26 }
 0x24b   : > { %v4540_v27 = vpop.eup %4539 }
 0x24c   : > { %v4542_v28 = vpop.eup %4541  ;;  %v5231_v31 = vmul.f32 %v4540_v27, %v1485_v7 }
 0x24d   : > { %v4544_v29 = vpop.eup %4543  ;;  %v5235_v33 = vmul.f32 %v4542_v28, %v1483_v10  ;;  %v4445_v10 = vld [vmem:[%s5651_s15 + $0x20] sm:$0xff]  }
 0x24e   : > { %v4546_v30 = vpop.eup %4545  ;;  %v5233_v32 = vmul.f32 %v4544_v29, %v1486_v13  ;;  %v1623_v13 = vpop.permute.xlu0 %1622 }
 0x24f   : > { %v5237_v34 = vmul.f32 %v4546_v30, %v1484_v16 }
 0x250   : > { %v1518_v37 = vpack.c.bf16 %v5233_v32, %v5231_v31 }
 0x251   : > { %v1517_v38 = vpack.c.bf16 %v5237_v34, %v5235_v33 }
 0x253   : > { %4275 = vmatprep.mubr.msk.bf16.mxu0 %vm1525_vm2, %v1517_v38 }
 0x254   : > { %4276 = vmatmul.mubr.msk.bf16.vlgmr.msra.gmra.mrb[8].mxu0 %vm1525_vm2, %v1518_v37 }
 0x255   : > { %4280 = vmatpush3.bf16.msra.mxu0 %v1599_v2  ;;  %4293 = vmatprep.mubr.msk.bf16.mxu0 %vm1640_vm3, %v4441_v39  ;;  %v4443_v2 = vld [vmem:[%s5651_s15 + $0x30] sm:$0xff]  }
 0x256   : > { %4281 = vmatprep.subr.bf16.mxu0 %v1600_v40  ;;  %4301 = vmatprep.mubr.msk.bf16.mxu1 %vm1338_vm1, %v4443_v2  ;;  %v1933_v2 = vld [vmem:[%s5289_s27 + $0x20] sm:$0xff] }
 0x259   : > { %4282 = vmatpush3.bf16.msra.mxu0 %v1600_v40 }
 0x25a   : > { %4283 = vmatprep.subr.bf16.mxu0 %v1601_v46 }
 0x25d   : > { %4284 = vmatpush3.bf16.msra.mxu0 %v1601_v46 }
 0x25e   : > { %4285 = vmatprep.subr.bf16.mxu0 %v1602_v51 }
 0x261   : > { %4286 = vmatpush3.bf16.msra.mxu0 %v1602_v51 }
 0x262   : > { %4287 = vmatprep.subr.bf16.mxu0 %v1603_v57 }
 0x265   : > { %4288 = vmatpush3.bf16.msra.mxu0 %v1603_v57  ;;  %v1930_v57 = vld [vmem:[%s5289_s27 + $0x8] sm:$0xff] }
 0x266   : > { %4289 = vmatprep.subr.bf16.mxu0 %v1604_v53  ;;  %v1939_v59 = vpack.c.bf16 %v1930_v57, %v1929_v55 }
 0x269   : > { %4290 = vmatpush3.bf16.msra.mxu0 %v1604_v53  ;;  %v1931_v53 = vld [vmem:[%s5289_s27 + $0x10] sm:$0xff] }
 0x26a   : > { %4291 = vmatprep.subr.bf16.mxu0 %v1605_v63 }
 0x26d   : > { %4292 = vmatpush3.bf16.msra.mxu0 %v1605_v63  ;;  %v4447_v63 = vld [vmem:[%s5687_s7] sm:$0xff]  }
 0x270   : > { %4294 = vmatmul.mubr.msk.bf16.vlgmr.msra.gmra.mrb[12].mxu0 %vm1640_vm3, %v4442_v0  ;;  %v1940_v0 = vpack.c.bf16 %v1932_v61, %v1931_v53 }
 0x327   : > { %v4277_v3 = vpop.f32.mrb[8].mxu0 }
 0x328   : > { %v1566_v4 = vpop.f32.mrb[9].mxu0 }
 0x329   : > { %v4278_v5 = vpop.f32.mrb[10].mxu0 }
 0x32a   : > { %v1737_v6 = vpack.c.bf16 %v4278_v5, %v4277_v3  ;;  %v1569_v7 = vpop.f32.mrb[11].mxu0  ;;  %v1934_v3 = vld [vmem:[%s5289_s27 + $0x28] sm:$0xff]  ;;  %v1935_v5 = vld [vmem:[%s5289_s27 + $0x30] sm:$0xff] }
 0x32b   : > { %v1736_v8 = vpack.c.bf16 %v1569_v7, %v1566_v4  ;;  %v1941_v4 = vpack.c.bf16 %v1934_v3, %v1933_v2 }
 0x32d   : > { %4297 = vmatprep.subr.bf16.mxu1 %v1736_v8 }
 0x32e   : > { %4298 = vmatpush3.bf16.msra.mxu1 %v1736_v8  ;;  %v1937_v8 = vld [vmem:[%s5289_s27 + $0x40] sm:$0xff] }
 0x32f   : > { %4299 = vmatprep.subr.bf16.mxu1 %v1737_v6 }
 0x332   : > { %4300 = vmatpush3.bf16.msra.mxu1 %v1737_v6  ;;  %v1936_v6 = vld [vmem:[%s5289_s27 + $0x38] sm:$0xff] }
 0x333   : > { %v1942_v7 = vpack.c.bf16 %v1936_v6, %v1935_v5  ;;  %v2375_v5 = vld [vmem:[%s848_s26 + $0x8] sm:$0xff]  ;;  %v2377_v6 = vld [vmem:[%s848_s26 + $0x18] sm:$0xff] }
 0x335   : > { %4302 = vmatmul.mubr.msk.bf16.vlgmr.msra.gmra.mrb[16].mxu1 %vm1338_vm1, %v4444_v9  ;;  %v1938_v9 = vld [vmem:[%s5289_s27 + $0x48] sm:$0xff] }
 0x336   : > { %4309 = vmatprep.mubr.msk.bf16.mxu1 %vm1338_vm1, %v4445_v10  ;;  %v1943_v10 = vpack.c.bf16 %v1938_v9, %v1937_v8  ;;  %v2385_v8 = vpack.c.bf16 %v2377_v6, %v2375_v5  ;;  %v2374_v9 = vld [vmem:[%s848_s26] sm:$0xff] }
 0x343   : > { %v4295_v14 = vpop.f32.mrb[12].mxu0 }
 0x344   : > { %v1690_v15 = vadd.f32 %v4295_v14, %v1623_v13  ;;  %v1681_v16 = vpop.f32.mrb[13].mxu0  ;;  %v4450_v13 = vld [vmem:[%s5651_s15 + $0x58] sm:$0xff]   ;;  %v4451_v14 = vld [vmem:[%s5651_s15 + $0x40] sm:$0xff]  }
 0x345   : > { %v1682_v18 = vadd.f32 %v1681_v16, %v1613_v11  ;;  %v4296_v19 = vpop.f32.mrb[14].mxu0  ;;  %v4448_v11 = vld [vmem:[%s5687_s7 + $0x8] sm:$0xff]  }
 0x346   : > { %v3916_v20 = vmul.f32 -1.442695, %v1690_v15  ;;  %v1693_v21 = vadd.f32 %v4296_v19, %v1628_v17  ;;  %v1684_v22 = vpop.f32.mrb[15].mxu0  ;;  %v1951_v19 = vpop.permute.xlu0 %1950 }
 0x347   : > { %v3914_v23 = vmul.f32 -1.442695, %v1682_v18  ;;  %v1685_v24 = vadd.f32 %v1684_v22, %v1618_v12  ;;  %v4449_v12 = vld [vmem:[%s5651_s15 + $0x50] sm:$0xff]  }
 0x348   : > { %4547 = vpow2.f32 %v3916_v20  ;;  %v3917_v25 = vmul.f32 -1.442695, %v1693_v21  ;;  %4331 = vmatprep.mubr.msk.bf16.mxu0 %vm1338_vm1, %v4449_v12  ;;  %v1956_v20 = vpop.permute.xlu1 %1955  ;;  %v2381_v12 = vld [vmem:[%s848_s26 + $0x38] sm:$0xff] }
 0x349   : > { %4549 = vpow2.f32 %v3914_v23  ;;  %v3915_v26 = vmul.f32 -1.442695, %v1685_v24 }
 0x34a   : > { %4551 = vpow2.f32 %v3917_v25 }
 0x34b   : > { %4553 = vpow2.f32 %v3915_v26 }
 0x34c   : > { %v1966_v25 = vpop.permute.xlu1 %1965 }
 0x352   : > { %v4548_v27 = vpop.eup %4547 }
 0x353   : > { %v4550_v28 = vpop.eup %4549  ;;  %v1710_v29 = vadd.f32 1.0, %v4548_v27 }
 0x354   : > { %v4552_v30 = vpop.eup %4551  ;;  %v1708_v35 = vadd.f32 1.0, %v4550_v28 }
 0x355   : > { %v4554_v36 = vpop.eup %4553  ;;  %4555 = vrcp.f32 %v1710_v29  ;;  %v1711_v37 = vadd.f32 1.0, %v4552_v30 }
 0x356   : > { %4557 = vrcp.f32 %v1708_v35  ;;  %v1709_v38 = vadd.f32 1.0, %v4554_v36 }
 0x357   : > { %4559 = vrcp.f32 %v1711_v37 }
 0x358   : > { %4561 = vrcp.f32 %v1709_v38 }
 0x35f   : > { %v4556_v39 = vpop.eup %4555 }
 0x360   : > { %v4558_v40 = vpop.eup %4557  ;;  %v5291_v51 = vmul.f32 %v4556_v39, %v1690_v15 }
 0x361   : > { %v4560_v41 = vpop.eup %4559  ;;  %v5278_v46 = vmul.f32 %v4558_v40, %v1682_v18 }
 0x362   : > { %v4562_v42 = vpop.eup %4561  ;;  %v5280_v48 = vmul.f32 %v4560_v41, %v1693_v21  ;;  %v1961_v21 = vpop.permute.xlu0 %1960 }
 0x363   : > { %v5282_v49 = vmul.f32 %v4562_v42, %v1685_v24 }
 0x364   : > { %v1730_v58 = vpack.c.bf16 %v5280_v48, %v5291_v51 }
 0x365   : > { %v1729_v52 = vpack.c.bf16 %v5282_v49, %v5278_v46 }
 0x367   : > { %4305 = vmatprep.subr.bf16.mxu1 %v1729_v52  ;;  %4327 = vmatprep.subr.bf16.mxu0 %v1729_v52 }
 0x368   : > { %4306 = vmatpush3.bf16.msra.mxu1 %v1729_v52  ;;  %4328 = vmatpush3.bf16.msra.mxu0 %v1729_v52 }
 0x369   : > { %4307 = vmatprep.subr.bf16.mxu1 %v1730_v58  ;;  %4329 = vmatprep.subr.bf16.mxu0 %v1730_v58 }
 0x36c   : > { %4308 = vmatpush3.bf16.msra.mxu1 %v1730_v58  ;;  %4330 = vmatpush3.bf16.msra.mxu0 %v1730_v58 }
 0x36d   : > { %4313 = vmatprep.subr.bf16.mxu1 %v1939_v59 }
 0x36f   : > { %4310 = vmatmul.mubr.msk.bf16.vlgmr.msra.gmra.mrb[16].mxu1 %vm1338_vm1, %v4446_v62  ;;  %4332 = vmatmul.mubr.msk.bf16.vlgmr.msra.gmra.mrb[16].mxu0 %vm1338_vm1, %v4450_v13  ;;  %v4452_v13 = vld [vmem:[%s5651_s15 + $0x48] sm:$0xff]  }
 0x370   : > { %4314 = vmatpush3.bf16.msra.mxu1 %v1939_v59  ;;  %4323 = vmatprep.mubr.msk.bf16.mxu1 %vm1978_vm4, %v4447_v63 }
 0x371   : > { %4315 = vmatprep.subr.bf16.mxu1 %v1940_v0  ;;  %4339 = vmatprep.mubr.msk.bf16.mxu0 %vm1338_vm1, %v4451_v14 }
 0x374   : > { %4316 = vmatpush3.bf16.msra.mxu1 %v1940_v0 }
 0x375   : > { %4317 = vmatprep.subr.bf16.mxu1 %v1941_v4 }
 0x378   : > { %4318 = vmatpush3.bf16.msra.mxu1 %v1941_v4 }
 0x379   : > { %4319 = vmatprep.subr.bf16.mxu1 %v1942_v7 }
 0x37c   : > { %4320 = vmatpush3.bf16.msra.mxu1 %v1942_v7 }
 0x37d   : > { %4321 = vmatprep.subr.bf16.mxu1 %v1943_v10 }
 0x380   : > { %4322 = vmatpush3.bf16.msra.mxu1 %v1943_v10  ;;  %v2376_v10 = vld [vmem:[%s848_s26 + $0x10] sm:$0xff] }
 0x381   : > { %v2384_v14 = vpack.c.bf16 %v2376_v10, %v2374_v9 }
 0x383   : > { %4324 = vmatmul.mubr.msk.bf16.vlgmr.msra.gmra.mrb[20].mxu1 %vm1978_vm4, %v4448_v11  ;;  %v2379_v11 = vld [vmem:[%s848_s26 + $0x28] sm:$0xff] }
 0x384   : > { %2349 = vmatprep.mubr.bf16.mxu1 %v4747_v1 }
 0x442   : > { %v5332_v15 = vpop.f32.mrb[16].mxu1 }
 0x443   : > { %v5334_v16 = vpop.f32.mrb[17].mxu1 }
 0x444   : > { %v5336_v17 = vpop.f32.mrb[18].mxu1 }
 0x445   : > { %v5338_v18 = vpop.f32.mrb[19].mxu1 }
 0x456   : > { %v4325_v22 = vpop.f32.mrb[20].mxu1 }
 0x457   : > { %v2028_v23 = vadd.f32 %v4325_v22, %v1961_v21  ;;  %v2019_v24 = vpop.f32.mrb[21].mxu1  ;;  %v2380_v21 = vld [vmem:[%s848_s26 + $0x30] sm:$0xff]  ;;  %v2383_v22 = vld [vmem:[%s848_s26 + $0x48] sm:$0xff] }
 0x458   : > { %v2020_v26 = vadd.f32 %v2019_v24, %v1951_v19  ;;  %v4326_v27 = vpop.f32.mrb[22].mxu1  ;;  %v2387_v19 = vpack.c.bf16 %v2381_v12, %v2379_v11 }
 0x459   : > { %v3948_v28 = vmul.f32 -1.442695, %v2028_v23  ;;  %v2031_v29 = vadd.f32 %v4326_v27, %v1966_v25  ;;  %v2022_v30 = vpop.f32.mrb[23].mxu1  ;;  %v2389_v25 = vpack.c.bf16 %v2383_v22, %v2383_v22 }
 0x45a   : > { %v3946_v35 = vmul.f32 -1.442695, %v2020_v26  ;;  %v2023_v36 = vadd.f32 %v2022_v30, %v1956_v20  ;;  %v2378_v20 = vld [vmem:[%s848_s26 + $0x20] sm:$0xff] }
 0x45b   : > { %4563 = vpow2.f32 %v3948_v28  ;;  %v3949_v37 = vmul.f32 -1.442695, %v2031_v29  ;;  %v2386_v24 = vpack.c.bf16 %v2380_v21, %v2378_v20  ;;  %v4453_v28 = vld [vmem:[%s5689_s9] sm:$0xff]  }
 0x45c   : > { %4565 = vpow2.f32 %v3946_v35  ;;  %v3947_v38 = vmul.f32 -1.442695, %v2023_v36  ;;  %v4457_v30 = vld [vmem:[%s5654_s18 + $0x4] ss:$8 sps:$4 sm:$0xff]   ;;  %v4455_v35 = vld [vmem:[%s5654_s18] ss:$8 sps:$4 sm:$0xff]  }
 0x45d   : > { %4567 = vpow2.f32 %v3949_v37  ;;  %2317 = vmatprep.subr.bf16.mxu1 %v4457_v30  ;;  %v4458_v37 = vld [vmem:[%s5654_s18 + $0x10] ss:$8 sps:$4 sm:$0xff]  }
 0x45e   : > { %4569 = vpow2.f32 %v3947_v38  ;;  %2318 = vmatpush1.bf16.msra.mxu1 %v4455_v35  ;;  %v4463_v38 = vld [vmem:[%s5654_s18 + $0x24] ss:$8 sps:$4 sm:$0xff]  }
 0x465   : > { %v4564_v39 = vpop.eup %4563 }
 0x466   : > { %v4566_v40 = vpop.eup %4565  ;;  %v2048_v41 = vadd.f32 1.0, %v4564_v39  ;;  %v4461_v39 = vld [vmem:[%s5654_s18 + $0x20] ss:$8 sps:$4 sm:$0xff]  }
 0x467   : > { %v4568_v42 = vpop.eup %4567  ;;  %v2046_v52 = vadd.f32 1.0, %v4566_v40  ;;  %v4466_v40 = vld [vmem:[%s5654_s18 + $0x34] ss:$8 sps:$4 sm:$0xff]  }
 0x468   : > { %v4570_v55 = vpop.eup %4569  ;;  %4571 = vrcp.f32 %v2048_v41  ;;  %v2049_v57 = vadd.f32 1.0, %v4568_v42  ;;  %v4464_v41 = vld [vmem:[%s5654_s18 + $0x30] ss:$8 sps:$4 sm:$0xff]   ;;  %v2212_v42 = vpop.permute.xlu0 %2211 }
 0x469   : > { %4573 = vrcp.f32 %v2046_v52  ;;  %v2047_v58 = vadd.f32 1.0, %v4570_v55  ;;  %v2217_v52 = vpop.permute.xlu1 %2216 }
 0x46a   : > { %4575 = vrcp.f32 %v2049_v57 }
 0x46b   : > { %4577 = vrcp.f32 %v2047_v58 }
 0x46c   : > { %v2222_v55 = vpop.permute.xlu0 %2221 }
 0x470   : > { %v2397_v11 = vpop.permute.xlu0 %2396 }
 0x472   : > { %v4572_v59 = vpop.eup %4571 }
 0x473   : > { %v4574_v53 = vpop.eup %4573  ;;  %v5351_v3 = vmul.f32 %v4572_v59, %v2028_v23  ;;  %v2382_v23 = vld [vmem:[%s848_s26 + $0x40] sm:$0xff] }
 0x474   : > { %v4576_v61 = vpop.eup %4575  ;;  %v5340_v63 = vmul.f32 %v4574_v53, %v2020_v26  ;;  %v2388_v26 = vpack.c.bf16 %v2382_v23, %v2382_v23  ;;  %v2227_v53 = vpop.permute.xlu1 %2226 }
 0x475   : > { %v4578_v62 = vpop.eup %4577  ;;  %v5342_v0 = vmul.f32 %v4576_v61, %v2031_v29  ;;  %v4454_v29 = vld [vmem:[%s5689_s9 + $0x8] sm:$0xff]  }
 0x476   : > { %v5344_v2 = vmul.f32 %v4578_v62, %v2023_v36  ;;  %v2433_v27 = vsel %vm2431_vm5, %v2388_v26, 0  ;;  %v4460_v36 = vld [vmem:[%s5654_s18 + $0x14] ss:$8 sps:$4 sm:$0xff]  }
 0x477   : > { %v2068_v7 = vpack.c.bf16 %v5342_v0, %v5351_v3  ;;  %2319 = vmatprep.subr.bf16.mxu1 %v4460_v36 }
 0x478   : > { %v2067_v4 = vpack.c.bf16 %v5344_v2, %v5340_v63  ;;  %2320 = vmatpush1.bf16.msra.mxu1 %v4458_v37 }
 0x479   : > { %2321 = vmatprep.subr.bf16.mxu1 %v4463_v38 }
 0x47a   : > { %4335 = vmatprep.subr.bf16.mxu0 %v2067_v4 }
 0x47b   : > { %4336 = vmatpush3.bf16.msra.mxu0 %v2067_v4 }
 0x47c   : > { %4337 = vmatprep.subr.bf16.mxu0 %v2068_v7  ;;  %2322 = vmatpush1.bf16.msra.mxu1 %v4461_v39 }
 0x47d   : > { %2323 = vmatprep.subr.bf16.mxu1 %v4466_v40  ;;  %v2407_v40 = vpop.permute.xlu0 %2406 }
 0x47f   : > { %4338 = vmatpush3.bf16.msra.mxu0 %v2068_v7 }
 0x480   : > { %2438 = vmatprep.subr.bf16.mxu0 %v2385_v8  ;;  %2324 = vmatpush1.bf16.msra.mxu1 %v4464_v41 }
 0x482   : > { %4340 = vmatmul.mubr.msk.bf16.vlgmr.msra.gmra.mrb[16].mxu0 %vm1338_vm1, %v4452_v13 }
 0x483   : > { %2439 = vmatpush1.bf16.msra.mxu0 %v2384_v14  ;;  %2470 = vmatprep.mubr.bf16.mxu0 %v4747_v1 }
 0x484   : > { %2440 = vmatprep.subr.bf16.mxu0 %v2387_v19  ;;  %v2402_v19 = vpop.permute.xlu1 %2401 }
 0x487   : > { %2441 = vmatpush1.bf16.msra.mxu0 %v2386_v24 }
 0x488   : > { %3986 = vmatprep.subr.msk.bf16.mxu0 %vm2431_vm5, %v2389_v25 }
 0x48b   : > { %2443 = vmatpush1.bf16.msra.mxu0 %v2433_v27 }
 0x48e   : > { %3987 = vmatmul.mubr.msk.bf16.vlgmr.msra.gmra.mrb[20].mxu0 %vm2424_vm6, %v4453_v28 }
 0x48f   : > { %2480 = vmatprep.mubr.bf16.mxu0 %v4747_v1 }
 0x496   : > { %3988 = vmatmul.mubr.msk.bf16.gmra.mrb[24].mxu0 %vm2424_vm6, %v4454_v29 }
 0x555   : > { %v4341_v57 = vpop.f32.mrb[16].mxu0 }
 0x556   : > { %v5393_v58 = vadd.f32 %v4341_v57, %v2222_v55  ;;  %v2189_v59 = vpop.f32.mrb[17].mxu0  ;;  %v2412_v57 = vpop.permute.xlu1 %2411 }
 0x557   : > { %v5395_v61 = vadd.f32 %v2212_v42, %v2189_v59  ;;  %v4342_v62 = vpop.f32.mrb[18].mxu0 }
 0x558   : > { %v3972_v4 = vmul.f32 -1.442695, %v5393_v58  ;;  %v5398_v5 = vadd.f32 %v4342_v62, %v2227_v53  ;;  %v2192_v6 = vpop.f32.mrb[19].mxu0 }
 0x559   : > { %v3970_v7 = vmul.f32 -1.442695, %v5395_v61  ;;  %v5401_v8 = vadd.f32 %v2217_v52, %v2192_v6 }
 0x55a   : > { %4579 = vpow2.f32 %v3972_v4  ;;  %v3973_v9 = vmul.f32 -1.442695, %v5398_v5 }
 0x55b   : > { %4581 = vpow2.f32 %v3970_v7  ;;  %v3971_v10 = vmul.f32 -1.442695, %v5401_v8 }
 0x55c   : > { %4583 = vpow2.f32 %v3973_v9 }
 0x55d   : > { %4585 = vpow2.f32 %v3971_v10 }
 0x561   : > { %v2472_v12 = vpop.f32.mrb[20].mxu0 }
 0x562   : > { %v5405_v13 = vadd.f32 %v2472_v12, %v2397_v11  ;;  %v2474_v14 = vpop.f32.mrb[21].mxu0 }
 0x563   : > { %v5407_v20 = vadd.f32 %v2474_v14, %v2397_v11  ;;  %v2476_v21 = vpop.f32.mrb[22].mxu0 }
 0x564   : > { %v4580_v22 = vpop.eup %4579  ;;  %v3989_v23 = vmul.f32 -1.442695, %v5405_v13  ;;  %v5410_v24 = vadd.f32 %v2476_v21, %v2402_v19  ;;  %v2478_v25 = vpop.f32.mrb[23].mxu0 }
 0x565   : > { %v4582_v26 = vpop.eup %4581  ;;  %v2247_v27 = vadd.f32 1.0, %v4580_v22  ;;  %v5412_v28 = vadd.f32 %v2478_v25, %v2402_v19  ;;  %v3990_v37 = vmul.f32 -1.442695, %v5407_v20 }
 0x566   : > { %v4584_v29 = vpop.eup %4583  ;;  %v2245_v30 = vadd.f32 1.0, %v4582_v26  ;;  %4587 = vpow2.f32 %v3989_v23  ;;  %v3991_v39 = vmul.f32 -1.442695, %v5410_v24 }
 0x567   : > { %v4586_v35 = vpop.eup %4585  ;;  %4589 = vrcp.f32 %v2247_v27  ;;  %v2248_v36 = vadd.f32 1.0, %v4584_v29  ;;  %v3992_v41 = vmul.f32 -1.442695, %v5412_v28 }
 0x568   : > { %4591 = vrcp.f32 %v2245_v30  ;;  %v2246_v38 = vadd.f32 1.0, %v4586_v35 }
 0x569   : > { %4593 = vrcp.f32 %v2248_v36  ;;  %v2482_v42 = vpop.f32.mrb[24].mxu0 }
 0x56a   : > { %4595 = vrcp.f32 %v2246_v38  ;;  %v5417_v52 = vadd.f32 %v2482_v42, %v2407_v40  ;;  %v2484_v55 = vpop.f32.mrb[25].mxu0 }
 0x56b   : > { %4597 = vpow2.f32 %v3990_v37  ;;  %v5419_v59 = vadd.f32 %v2484_v55, %v2407_v40  ;;  %v2486_v53 = vpop.f32.mrb[26].mxu0 }
 0x56c   : > { %4599 = vpow2.f32 %v3991_v39  ;;  %v3993_v62 = vmul.f32 -1.442695, %v5417_v52  ;;  %v5422_v4 = vadd.f32 %v2486_v53, %v2412_v57  ;;  %v2488_v6 = vpop.f32.mrb[27].mxu0 }
 0x56d   : > { %4601 = vpow2.f32 %v3992_v41  ;;  %v3994_v7 = vmul.f32 -1.442695, %v5419_v59  ;;  %v2489_v9 = vadd.f32 %v2488_v6, %v2412_v57 }
 0x56e   : > { %4603 = vpow2.f32 %v3993_v62  ;;  %v3995_v10 = vmul.f32 -1.442695, %v5422_v4 }
 0x56f   : > { %4605 = vpow2.f32 %v3994_v7  ;;  %v3996_v11 = vmul.f32 -1.442695, %v2489_v9 }
 0x570   : > { %v4588_v12 = vpop.eup %4587  ;;  %4607 = vpow2.f32 %v3995_v10 }
 0x571   : > { %v4590_v14 = vpop.eup %4589  ;;  %4609 = vpow2.f32 %v3996_v11  ;;  %v2515_v22 = vadd.f32 1.0, %v4588_v12 }
 0x572   : > { %v4592_v19 = vpop.eup %4591  ;;  %v5427_v25 = vmul.f32 %v4590_v14, %v5393_v58 }
 0x573   : > { %v4594_v21 = vpop.eup %4593  ;;  %v5433_v29 = vmul.f32 %v4592_v19, %v5395_v61  ;;  %4611 = vrcp.f32 %v2515_v22 }
 0x574   : > { %v4596_v23 = vpop.eup %4595  ;;  %v5430_v26 = vmul.f32 %v4594_v21, %v5398_v5 }
 0x575   : > { %v4598_v27 = vpop.eup %4597  ;;  %v5436_v30 = vmul.f32 %v4596_v23, %v5401_v8 }
 0x576   : > { %v4600_v35 = vpop.eup %4599  ;;  %v2270_v36 = vpack.c.bf16 %v5430_v26, %v5427_v25  ;;  %v2516_v37 = vadd.f32 1.0, %v4598_v27 }
 0x577   : > { %v4602_v38 = vpop.eup %4601  ;;  %v2269_v58 = vpack.c.bf16 %v5436_v30, %v5433_v29  ;;  %v2517_v39 = vadd.f32 1.0, %v4600_v35 }
 0x578   : > { %v4604_v5 = vpop.eup %4603  ;;  %4613 = vrcp.f32 %v2516_v37  ;;  %v2518_v40 = vadd.f32 1.0, %v4602_v38 }
 0x579   : > { %v4606_v41 = vpop.eup %4605  ;;  %4615 = vrcp.f32 %v2517_v39  ;;  %v2519_v61 = vadd.f32 1.0, %v4604_v5  ;;  %3982 = vmatmul.mubr.msk.bf16.vlgmr.msra.gmra.mrb[24].mxu1 %vm977_vm0, %v2269_v58 }
 0x57a   : > { %v4608_v8 = vpop.eup %4607  ;;  %4617 = vrcp.f32 %v2518_v40  ;;  %v2520_v42 = vadd.f32 1.0, %v4606_v41  ;;  %2359 = vmatprep.mubr.bf16.mxu1 %v4747_v1 }
 0x57b   : > { %v4610_v55 = vpop.eup %4609  ;;  %4619 = vrcp.f32 %v2519_v61  ;;  %v2521_v57 = vadd.f32 1.0, %v4608_v8 }
 0x57c   : > { %4621 = vrcp.f32 %v2520_v42  ;;  %v2522_v53 = vadd.f32 1.0, %v4610_v55 }
 0x57d   : > { %4623 = vrcp.f32 %v2521_v57  ;;  %v4612_v62 = vpop.eup %4611 }
 0x57e   : > { %4625 = vrcp.f32 %v2522_v53  ;;  %v2539_v11 = vmul.f32 %v4612_v62, %v5405_v13  ;;  %v4470_v62 = vld [vmem:[%s5651_s15 + $0x68] sm:$0xff]  }
 0x581   : > { %3983 = vmatmul.mubr.msk.bf16.gmra.mrb[28].mxu1 %vm977_vm0, %v2270_v36 }
 0x582   : > { %v4614_v6 = vpop.eup %4613  ;;  %2613 = vmatprep.mubr.bf16.mxu1 %v4747_v1 }
 0x583   : > { %v4616_v7 = vpop.eup %4615  ;;  %v2540_v19 = vmul.f32 %v4614_v6, %v5407_v20  ;;  %v4471_v6 = vld [vmem:[%s5655_s19 + $0x40] sm:$0xff]  }
 0x584   : > { %v4618_v10 = vpop.eup %4617  ;;  %v2541_v12 = vmul.f32 %v4616_v7, %v5410_v24  ;;  %v4472_v7 = vld [vmem:[%s5655_s19] sm:$0xff]   ;;  %4195 = vmatprep.subr.bf16.mxu0 %v4471_v6 }
 0x585   : > { %v4620_v14 = vpop.eup %4619  ;;  %v2542_v21 = vmul.f32 %v4618_v10, %v5412_v28  ;;  %4196 = vmatpush3.bf16.msra.mxu0 %v4472_v7  ;;  %v4474_v10 = vld [vmem:[%s5655_s19 + $0x8] sm:$0xff]  }
 0x586   : > { %v4622_v22 = vpop.eup %4621  ;;  %v2552_v23 = vpack.c.bf16 %v2541_v12, %v2539_v11  ;;  %v2543_v36 = vmul.f32 %v4620_v14, %v5417_v52  ;;  %v4475_v11 = vld [vmem:[%s5655_s19 + $0x50] sm:$0xff]   ;;  %v4477_v14 = vld [vmem:[%s5655_s19 + $0x58] sm:$0xff]  }
 0x587   : > { %v4624_v27 = vpop.eup %4623  ;;  %v2553_v35 = vpack.c.bf16 %v2542_v21, %v2540_v19  ;;  %v2544_v58 = vmul.f32 %v4622_v22, %v5419_v59  ;;  %v4467_v59 = vld [vmem:[%s5651_s15 + $0x70] sm:$0xff]   ;;  %v4478_v19 = vld [vmem:[%s5655_s19 + $0x18] sm:$0xff]   ;;  %v4479_v21 = vld [vmem:[%s5655_s19 + $0x60] sm:$0xff]  }
 0x588   : > { %v4626_v37 = vpop.eup %4625  ;;  %v2545_v38 = vmul.f32 %v4624_v27, %v5422_v4  ;;  %v4468_v4 = vld [vmem:[%s5651_s15 + $0x78] sm:$0xff]   ;;  %v4476_v12 = vld [vmem:[%s5655_s19 + $0x10] sm:$0xff]   ;;  %v4480_v22 = vld [vmem:[%s5655_s19 + $0x20] sm:$0xff]  }
 0x589   : > { %v2546_v39 = vmul.f32 %v4626_v37, %v2489_v9  ;;  %v4469_v9 = vld [vmem:[%s5651_s15 + $0x60] sm:$0xff]   ;;  %v4482_v27 = vld [vmem:[%s5655_s19 + $0x28] sm:$0xff]   ;;  %v4484_v37 = vld [vmem:[%s5655_s19 + $0x30] sm:$0xff]  }
 0x58a   : > { %v2554_v13 = vpack.c.bf16 %v2545_v38, %v2543_v36  ;;  %v4485_v36 = vld [vmem:[%s5655_s19 + $0x78] sm:$0xff]  }
 0x58b   : > { %v2555_v5 = vpack.c.bf16 %v2546_v39, %v2544_v58  ;;  %v4486_v38 = vld [vmem:[%s5655_s19 + $0x38] sm:$0xff]   ;;  %v2711_v58 = vpop.permute.xlu0 %2710 }
 0x64c   : > { %v2351_v24 = vpop.f32.mrb[24].mxu1 }
 0x64d   : > { %v2353_v40 = vpop.f32.mrb[25].mxu1 }
 0x64e   : > { %v2355_v41 = vpop.f32.mrb[26].mxu1 }
 0x64f   : > { %v2561_v20 = vpack.c.bf16 %v2355_v41, %v2351_v24  ;;  %v2357_v61 = vpop.f32.mrb[27].mxu1  ;;  %v2716_v24 = vpop.permute.xlu1 %2715 }
 0x650   : > { %v2562_v28 = vpack.c.bf16 %v2357_v61, %v2353_v40 }
 0x652   : > { %2581 = vmatprep.subr.bf16.mxu1 %v2562_v28 }
 0x653   : > { %2582 = vmatpush1.bf16.msra.mxu1 %v2561_v20 }
 0x654   : > { %v2361_v8 = vpop.f32.mrb[28].mxu1 }
 0x655   : > { %v2363_v42 = vpop.f32.mrb[29].mxu1 }
 0x656   : > { %v2365_v55 = vpop.f32.mrb[30].mxu1 }
 0x657   : > { %v2563_v57 = vpack.c.bf16 %v2365_v55, %v2361_v8  ;;  %v2367_v52 = vpop.f32.mrb[31].mxu1 }
 0x658   : > { %v2564_v53 = vpack.c.bf16 %v2367_v52, %v2363_v42  ;;  %v2721_v52 = vpop.permute.xlu0 %2720 }
 0x65a   : > { %2583 = vmatprep.subr.bf16.mxu1 %v2564_v53 }
 0x65b   : > { %2584 = vmatpush1.bf16.msra.mxu1 %v2563_v57 }
 0x65c   : > { %2650 = vmatprep.subr.bf16.mxu1 %v2553_v35  ;;  %v4483_v35 = vld [vmem:[%s5655_s19 + $0x70] sm:$0xff]  }
 0x65e   : > { %4007 = vmatmul.mubr.msk.bf16.vlgmr.msra.gmra.mrb[32].mxu1 %vm1338_vm1, %v4467_v59 }
 0x65f   : > { %2651 = vmatpush1.bf16.msra.mxu1 %v2552_v23  ;;  %2623 = vmatprep.mubr.bf16.mxu1 %v4747_v1  ;;  %v4481_v23 = vld [vmem:[%s5655_s19 + $0x68] sm:$0xff]  }
 0x660   : > { %2652 = vmatprep.subr.bf16.mxu1 %v2555_v5 }
 0x663   : > { %2653 = vmatpush1.bf16.msra.mxu1 %v2554_v13 }
 0x666   : > { %4008 = vmatmul.mubr.msk.bf16.gmra.mrb[36].mxu1 %vm1338_vm1, %v4468_v4 }
 0x667   : > { %2682 = vmatprep.mubr.bf16.mxu1 %v4747_v1 }
 0x66e   : > { %4011 = vmatmul.mubr.msk.bf16.vlgmr.msra.gmra.mrb[32].mxu1 %vm1338_vm1, %v4469_v9  ;;  %v2726_v9 = vpop.permute.xlu1 %2725 }
 0x66f   : > { %2692 = vmatprep.mubr.bf16.mxu1 %v4747_v1  ;;  %v4473_v1 = vld [vmem:[%s5655_s19 + $0x48] sm:$0xff]  }
 0x670   : > { %4197 = vmatprep.subr.bf16.mxu0 %v4473_v1 }
 0x671   : > { %4198 = vmatpush3.bf16.msra.mxu0 %v4474_v10 }
 0x672   : > { %4199 = vmatprep.subr.bf16.mxu0 %v4475_v11 }
 0x675   : > { %4200 = vmatpush3.bf16.msra.mxu0 %v4476_v12 }
 0x676   : > { %4012 = vmatmul.mubr.msk.bf16.gmra.mrb[36].mxu1 %vm1338_vm1, %v4470_v62  ;;  %4201 = vmatprep.subr.bf16.mxu0 %v4477_v14 }
 0x679   : > { %4202 = vmatpush3.bf16.msra.mxu0 %v4478_v19 }
 0x67a   : > { %4203 = vmatprep.subr.bf16.mxu0 %v4479_v21 }
 0x67d   : > { %4204 = vmatpush3.bf16.msra.mxu0 %v4480_v22 }
 0x67e   : > { %4205 = vmatprep.subr.bf16.mxu0 %v4481_v23 }
 0x681   : > { %4206 = vmatpush3.bf16.msra.mxu0 %v4482_v27 }
 0x682   : > { %4207 = vmatprep.subr.bf16.mxu0 %v4483_v35 }
 0x685   : > { %4208 = vmatpush3.bf16.msra.mxu0 %v4484_v37 }
 0x686   : > { %4209 = vmatprep.subr.bf16.mxu0 %v4485_v36 }
 0x689   : > { %4210 = vmatpush3.bf16.msra.mxu0 %v4486_v38 }
 0x741   : > { %v2684_v39 = vpop.f32.mrb[32].mxu1 }
 0x742   : > { %v2728_v13 = vadd.f32 %v2711_v58, %v2684_v39  ;;  %v2686_v5 = vpop.f32.mrb[33].mxu1 }
 0x743   : > { %v2729_v40 = vadd.f32 %v2711_v58, %v2686_v5  ;;  %v2688_v41 = vpop.f32.mrb[34].mxu1 }
 0x744   : > { %v4017_v20 = vmul.f32 -1.442695, %v2728_v13  ;;  %v2730_v61 = vadd.f32 %v2716_v24, %v2688_v41  ;;  %v2690_v28 = vpop.f32.mrb[35].mxu1 }
 0x745   : > { %v4018_v8 = vmul.f32 -1.442695, %v2729_v40  ;;  %v2731_v42 = vadd.f32 %v2716_v24, %v2690_v28 }
 0x746   : > { %4627 = vpow2.f32 %v4017_v20  ;;  %v4019_v55 = vmul.f32 -1.442695, %v2730_v61 }
 0x747   : > { %4629 = vpow2.f32 %v4018_v8  ;;  %v4020_v57 = vmul.f32 -1.442695, %v2731_v42 }
 0x748   : > { %4631 = vpow2.f32 %v4019_v55 }
 0x749   : > { %4633 = vpow2.f32 %v4020_v57  ;;  %v2694_v53 = vpop.f32.mrb[36].mxu1 }
 0x74a   : > { %v2732_v59 = vadd.f32 %v2721_v52, %v2694_v53  ;;  %v2696_v4 = vpop.f32.mrb[37].mxu1 }
 0x74b   : > { %v2733_v62 = vadd.f32 %v2721_v52, %v2696_v4  ;;  %v2698_v6 = vpop.f32.mrb[38].mxu1 }
 0x74c   : > { %v4021_v7 = vmul.f32 -1.442695, %v2732_v59  ;;  %v2734_v1 = vadd.f32 %v2726_v9, %v2698_v6  ;;  %v2700_v10 = vpop.f32.mrb[39].mxu1 }
 0x74d   : > { %v4022_v11 = vmul.f32 -1.442695, %v2733_v62  ;;  %v2735_v12 = vadd.f32 %v2726_v9, %v2700_v10 }
 0x74e   : > { %4635 = vpow2.f32 %v4021_v7  ;;  %v4023_v14 = vmul.f32 -1.442695, %v2734_v1 }
 0x74f   : > { %4637 = vpow2.f32 %v4022_v11  ;;  %v4024_v19 = vmul.f32 -1.442695, %v2735_v12 }
 0x750   : > { %v4628_v21 = vpop.eup %4627  ;;  %4639 = vpow2.f32 %v4023_v14 }
 0x751   : > { %v4630_v22 = vpop.eup %4629  ;;  %v2760_v23 = vadd.f32 1.0, %v4628_v21  ;;  %4641 = vpow2.f32 %v4024_v19 }
 0x752   : > { %v4632_v27 = vpop.eup %4631  ;;  %v2761_v35 = vadd.f32 1.0, %v4630_v22 }
 0x753   : > { %v4634_v37 = vpop.eup %4633  ;;  %4643 = vrcp.f32 %v2760_v23  ;;  %v2762_v36 = vadd.f32 1.0, %v4632_v27 }
 0x754   : > { %4645 = vrcp.f32 %v2761_v35  ;;  %v2763_v38 = vadd.f32 1.0, %v4634_v37  ;;  %v4487_v35 = vld [vmem:[%s5651_s15 + $0x80] sm:$0xff]  }
 0x755   : > { %4647 = vrcp.f32 %v2762_v36  ;;  %4347 = vmatprep.mubr.msk.bf16.mxu1 %vm1338_vm1, %v4487_v35 }
 0x756   : > { %4649 = vrcp.f32 %v2763_v38 }
 0x758   : > { %v4636_v58 = vpop.eup %4635 }
 0x759   : > { %v4638_v39 = vpop.eup %4637  ;;  %v2764_v5 = vadd.f32 1.0, %v4636_v58 }
 0x75a   : > { %v4640_v24 = vpop.eup %4639  ;;  %v2765_v41 = vadd.f32 1.0, %v4638_v39  ;;  %v2974_v39 = vadd.f32 %v5436_v30, %v5344_v2  ;;  %v4488_v2 = vld [vmem:[%s5651_s15 + $0x88] sm:$0xff]   ;;  %v1881_v30 = vpop.permute.xlu1 %1880 }
 0x75b   : > { %v4642_v20 = vpop.eup %4641  ;;  %4651 = vrcp.f32 %v2764_v5  ;;  %v2766_v28 = vadd.f32 1.0, %v4640_v24 }
 0x75c   : > { %4653 = vrcp.f32 %v2765_v41  ;;  %v2767_v8 = vadd.f32 1.0, %v4642_v20 }
 0x75d   : > { %v4644_v55 = vpop.eup %4643  ;;  %4655 = vrcp.f32 %v2766_v28 }
 0x75e   : > { %v4646_v57 = vpop.eup %4645  ;;  %v2784_v52 = vmul.f32 %v4644_v55, %v2728_v13  ;;  %4657 = vrcp.f32 %v2767_v8  ;;  %v2975_v8 = vadd.f32 %v5427_v25, %v5351_v3  ;;  %v4489_v3 = vld [vmem:[%s5651_s15 + $0x90] sm:$0xff]   ;;  %v1876_v25 = vpop.permute.xlu0 %1875 }
 0x75f   : > { %v4648_v53 = vpop.eup %4647  ;;  %v2785_v4 = vmul.f32 %v4646_v57, %v2729_v40 }
 0x760   : > { %v4650_v9 = vpop.eup %4649  ;;  %3590 = vst [vmem:[%s873_s14] sm:$0xff] %v2784_v52  ;;  %v2786_v6 = vmul.f32 %v4648_v53, %v2730_v61 }
 0x761   : > { %3591 = vst [vmem:[%s873_s14 + $0x8] sm:$0xff] %v2785_v4  ;;  %v2787_v7 = vmul.f32 %v4650_v9, %v2731_v42 }
 0x762   : > { %v2824_v10 = vpack.c.bf16 %v2786_v6, %v2784_v52  ;;  %3592 = vst [vmem:[%s873_s14 + $0x10] sm:$0xff] %v2786_v6  ;;  %v2976_v52 = vadd.f32 %v5430_v26, %v5342_v0  ;;  %v2996_v9 = vpop.permute.xlu0 %2995  ;;  %v3001_v0 = vpop.permute.xlu1 %3000 }
 0x763   : > { %3593 = vst [vmem:[%s873_s14 + $0x18] sm:$0xff] %v2787_v7  ;;  %v2825_v11 = vpack.c.bf16 %v2787_v7, %v2785_v4 }
 0x765   : > { %v4652_v14 = vpop.eup %4651  ;;  %2956 = vmatprep.mubr.bf16.mxu0 %v2825_v11 }
 0x766   : > { %v4654_v19 = vpop.eup %4653  ;;  %v2788_v21 = vmul.f32 %v4652_v14, %v2732_v59  ;;  %2957 = vmatmul.mubr.bf16.vlgmr.msra.gmra.mrb[28].mxu0 %v2824_v10  ;;  %v1886_v26 = vpop.permute.xlu0 %1885  ;;  %v1893_v10 = vadd.f32 %v1876_v25, %v5334_v16  ;;  %v1894_v14 = vadd.f32 %v1881_v30, %v5338_v18 }
 0x767   : > { %v4656_v22 = vpop.eup %4655  ;;  %v2789_v23 = vmul.f32 %v4654_v19, %v2733_v62  ;;  %v1895_v6 = vadd.f32 %v5332_v15, %v1886_v26  ;;  %v1891_v7 = vpop.permute.xlu1 %1890 }
 0x768   : > { %v4658_v13 = vpop.eup %4657  ;;  %3594 = vst [vmem:[%s873_s14 + $0x20] sm:$0xff] %v2788_v21  ;;  %v2790_v27 = vmul.f32 %v4656_v22, %v2734_v1  ;;  %v2973_v1 = vadd.f32 %v5433_v29, %v5340_v63  ;;  %v1896_v11 = vadd.f32 %v5336_v17, %v1891_v7 }
 0x769   : > { %3595 = vst [vmem:[%s873_s14 + $0x28] sm:$0xff] %v2789_v23  ;;  %v2791_v40 = vmul.f32 %v4658_v13, %v2735_v12  ;;  %v3940_v19 = vmul.f32 -1.442695, %v1895_v6 }
 0x76a   : > { %3596 = vst [vmem:[%s873_s14 + $0x30] sm:$0xff] %v2790_v27  ;;  %v2826_v61 = vpack.c.bf16 %v2790_v27, %v2788_v21  ;;  %v3938_v21 = vmul.f32 -1.442695, %v1893_v10  ;;  %v3941_v22 = vmul.f32 -1.442695, %v1896_v11  ;;  %v3006_v13 = vpop.permute.xlu0 %3005 }
 0x76b   : > { %3597 = vst [vmem:[%s873_s14 + $0x38] sm:$0xff] %v2791_v40  ;;  %v2827_v42 = vpack.c.bf16 %v2791_v40, %v2789_v23  ;;  %v3939_v23 = vmul.f32 -1.442695, %v1894_v14  ;;  %4659 = vpow2.f32 %v3940_v19  ;;  %v3011_v15 = vpop.permute.xlu1 %3010  ;;  %s878_s14 = scalar_lea.vmem %s5658_s22, %s5549_s1 }
 0x76c   : > { %4661 = vpow2.f32 %v3938_v21 }
 0x76d   : > { %2964 = vmatprep.mubr.bf16.mxu0 %v2827_v42  ;;  %4663 = vpow2.f32 %v3941_v22 }
 0x76e   : > { %2965 = vmatmul.mubr.bf16.gmra.mrb[32].mxu0 %v2826_v61  ;;  %4665 = vpow2.f32 %v3939_v23 }
 0x76f   : > { %4355 = vmatprep.mubr.msk.bf16.mxu0 %vm1338_vm1, %v4489_v3 }
 0x839   : > { %v4211_v59 = vpop.f32.mrb[28].mxu0 }
 0x83a   : > { %v4212_v37 = vpop.f32.mrb[29].mxu0 }
 0x83b   : > { %v4213_v62 = vadd.f32 %v4212_v37, %v4211_v59  ;;  %v4214_v36 = vpop.f32.mrb[30].mxu0 }
 0x83c   : > { %v4215_v12 = vpop.f32.mrb[31].mxu0 }
 0x83d   : > { %v2977_v38 = vadd.f32 %v4213_v62, %v2973_v1  ;;  %v4216_v58 = vadd.f32 %v4215_v12, %v4214_v36  ;;  %v4660_v62 = vpop.eup %4659 }
 0x83e   : > { %v4662_v36 = vpop.eup %4661 }
 0x83f   : > { %v2978_v5 = vadd.f32 %v4216_v58, %v2974_v39  ;;  %v1911_v39 = vadd.f32 1.0, %v4660_v62 }
 0x841   : > { %v4217_v24 = vpop.f32.mrb[32].mxu0  ;;  %v2986_v41 = vpack.c.bf16 %v2978_v5, %v2977_v38  ;;  %v4664_v38 = vpop.eup %4663  ;;  %v1909_v5 = vadd.f32 1.0, %v4662_v36 }
 0x842   : > { %v4218_v20 = vpop.f32.mrb[33].mxu0  ;;  %v4666_v58 = vpop.eup %4665 }
 0x843   : > { %v4219_v28 = vadd.f32 %v4218_v20, %v4217_v24  ;;  %v4220_v55 = vpop.f32.mrb[34].mxu0  ;;  %4343 = vmatprep.subr.bf16.mxu1 %v2986_v41  ;;  %v1912_v24 = vadd.f32 1.0, %v4664_v38 }
 0x844   : > { %v4221_v57 = vpop.f32.mrb[35].mxu0  ;;  %4344 = vmatpush3.bf16.msra.mxu1 %v2986_v41  ;;  %v1910_v41 = vadd.f32 1.0, %v4666_v58 }
 0x845   : > { %v2979_v63 = vadd.f32 %v4219_v28, %v2975_v8  ;;  %v4222_v29 = vadd.f32 %v4221_v57, %v4220_v55 }
 0x847   : > { %v2980_v53 = vadd.f32 %v4222_v29, %v2976_v52 }
 0x849   : > { %v2987_v4 = vpack.c.bf16 %v2980_v53, %v2979_v63 }
 0x84b   : > { %4345 = vmatprep.subr.bf16.mxu1 %v2987_v4 }
 0x84c   : > { %4346 = vmatpush3.bf16.msra.mxu1 %v2987_v4 }
 0x84f   : > { %4348 = vmatmul.mubr.msk.bf16.vlgmr.msra.gmra.mrb[40].mxu1 %vm1338_vm1, %v4488_v2 }
 0x922   : > { %v4349_v27 = vpop.f32.mrb[40].mxu1 }
 0x923   : > { %v3072_v40 = vadd.f32 %v4349_v27, %v3006_v13  ;;  %v3063_v61 = vpop.f32.mrb[41].mxu1 }
 0x924   : > { %v3064_v42 = vadd.f32 %v3063_v61, %v2996_v9  ;;  %v4350_v35 = vpop.f32.mrb[42].mxu1 }
 0x925   : > { %v4055_v16 = vmul.f32 -1.442695, %v3072_v40  ;;  %v3075_v59 = vadd.f32 %v4350_v35, %v3011_v15  ;;  %v3066_v17 = vpop.f32.mrb[43].mxu1 }
 0x926   : > { %v4053_v37 = vmul.f32 -1.442695, %v3064_v42  ;;  %v3067_v18 = vadd.f32 %v3066_v17, %v3001_v0  ;;  %v3129_v17 = vpop.permute.xlu0 %3128 }
 0x927   : > { %4667 = vpow2.f32 %v4055_v16  ;;  %v4056_v1 = vmul.f32 -1.442695, %v3075_v59  ;;  %v4493_v16 = vld [vmem:[%s5656_s20 + $0x10] sm:$0xff]  }
 0x928   : > { %4669 = vpow2.f32 %v4053_v37  ;;  %v4054_v12 = vmul.f32 -1.442695, %v3067_v18  ;;  %v3134_v37 = vpop.permute.xlu1 %3133 }
 0x929   : > { %4671 = vpow2.f32 %v4056_v1 }
 0x92a   : > { %4673 = vpow2.f32 %v4054_v12 }
 0x92b   : > { %4675 = vrcp.f32 %v1911_v39 }
 0x92c   : > { %4677 = vrcp.f32 %v1909_v5  ;;  %v3144_v12 = vpop.permute.xlu1 %3143 }
 0x92d   : > { %4679 = vrcp.f32 %v1912_v24 }
 0x92e   : > { %4681 = vrcp.f32 %v1910_v41 }
 0x931   : > { %v4668_v20 = vpop.eup %4667 }
 0x932   : > { %v4670_v28 = vpop.eup %4669  ;;  %v3092_v8 = vadd.f32 1.0, %v4668_v20 }
 0x933   : > { %v4672_v55 = vpop.eup %4671  ;;  %v3090_v57 = vadd.f32 1.0, %v4670_v28 }
 0x934   : > { %v4674_v63 = vpop.eup %4673  ;;  %4683 = vrcp.f32 %v3092_v8  ;;  %v3093_v29 = vadd.f32 1.0, %v4672_v55 }
 0x935   : > { %4685 = vrcp.f32 %v3090_v57  ;;  %v3091_v52 = vadd.f32 1.0, %v4674_v63  ;;  %v4676_v53 = vpop.eup %4675 }
 0x936   : > { %4687 = vrcp.f32 %v3093_v29  ;;  %v4678_v4 = vpop.eup %4677  ;;  %v1923_v25 = vmul.f32 %v4676_v53, %v1895_v6 }
 0x937   : > { %4689 = vrcp.f32 %v3091_v52  ;;  %v4680_v2 = vpop.eup %4679  ;;  %v1921_v30 = vmul.f32 %v4678_v4, %v1893_v10 }
 0x938   : > { %v4682_v3 = vpop.eup %4681  ;;  %v1924_v9 = vmul.f32 %v4680_v2, %v1896_v11  ;;  %v3108_v19 = vadd.f32 %v1923_v25, %v5291_v51 }
 0x939   : > { %v1922_v26 = vmul.f32 %v4682_v3, %v1894_v14  ;;  %v3106_v23 = vadd.f32 %v1921_v30, %v5278_v46 }
 0x93a   : > { %v3109_v27 = vadd.f32 %v1924_v9, %v5280_v48  ;;  %v4490_v48 = vld [vmem:[%s5651_s15 + $0x98] sm:$0xff]  }
 0x93b   : > { %v3107_v11 = vadd.f32 %v1922_v26, %v5282_v49  ;;  %v4491_v49 = vld [vmem:[%s5656_s20] sm:$0xff]  }
 0x93c   : > { %4359 = vmatprep.subr.bf16.mxu1 %v4491_v49 }
 0x93d   : > { %4360 = vmatpush3.bf16.msra.mxu1 %v4491_v49 }
 0x93e   : > { %v4684_v0 = vpop.eup %4683 }
 0x93f   : > { %v4686_v7 = vpop.eup %4685  ;;  %v3104_v21 = vmul.f32 %v4684_v0, %v3072_v40 }
 0x940   : > { %v4688_v22 = vpop.eup %4687  ;;  %v3102_v13 = vmul.f32 %v4686_v7, %v3064_v42  ;;  %v4492_v42 = vld [vmem:[%s5656_s20 + $0x8] sm:$0xff]  }
 0x941   : > { %v4690_v6 = vpop.eup %4689  ;;  %v3112_v61 = vadd.f32 %v3108_v19, %v3104_v21  ;;  %3600 = vst.msk [vmem:[%s878_s14 + $0x10] sm:$0xff] %vm977_vm0, %v3104_v21  ;;  %v3105_v10 = vmul.f32 %v4688_v22, %v3075_v59  ;;  %4361 = vmatprep.subr.bf16.mxu1 %v4492_v42  ;;  %v4494_v59 = vld [vmem:[%s5656_s20 + $0x18] sm:$0xff]  }
 0x942   : > { %v3110_v14 = vadd.f32 %v3106_v23, %v3102_v13  ;;  %3598 = vst.msk [vmem:[%s878_s14] sm:$0xff] %vm977_vm0, %v3102_v13  ;;  %v3103_v15 = vmul.f32 %v4690_v6, %v3067_v18  ;;  %4362 = vmatpush3.bf16.msra.mxu1 %v4492_v42  ;;  %v3139_v18 = vpop.permute.xlu0 %3138  ;;  %v4495_v23 = vld [vmem:[%s5651_s15 + $0xa0] sm:$0xff]   ;;  %v3241_v13 = vadd.f32 %v5231_v31, %v5210_v60  ;;  %v3356_v60 = vpop.permute.xlu1 %3355 }
 0x943   : > { %v3113_v35 = vadd.f32 %v3109_v27, %v3105_v10  ;;  %3601 = vst.msk [vmem:[%s878_s14 + $0x18] sm:$0xff] %vm977_vm0, %v3105_v10  ;;  %4363 = vmatprep.subr.bf16.mxu1 %v4493_v16  ;;  %v3239_v27 = vadd.f32 %v5235_v33, %v5198_v54  ;;  %v4496_v54 = vld [vmem:[%s5651_s15 + $0xa8] sm:$0xff]  }
 0x944   : > { %v3111_v51 = vadd.f32 %v3107_v11, %v3103_v15  ;;  %3599 = vst.msk [vmem:[%s878_s14 + $0x8] sm:$0xff] %vm977_vm0, %v3103_v15  ;;  %v3242_v11 = vadd.f32 %v5233_v32, %v5200_v56  ;;  %v4497_v56 = vld [vmem:[%s5651_s15 + $0xb0] sm:$0xff]  }
 0x945   : > { %v3120_v46 = vpack.c.bf16 %v3113_v35, %v3112_v61  ;;  %v3240_v35 = vadd.f32 %v5237_v34, %v5193_v50 }
 0x946   : > { %v3119_v40 = vpack.c.bf16 %v3111_v51, %v3110_v14  ;;  %4364 = vmatpush3.bf16.msra.mxu1 %v4493_v16  ;;  %v3351_v50 = vpop.permute.xlu0 %3350  ;;  %v3366_v42 = vpop.permute.xlu1 %3365 }
 0x947   : > { %4365 = vmatprep.subr.bf16.mxu1 %v4494_v59 }
 0x948   : > { %4351 = vmatprep.subr.bf16.mxu0 %v3119_v40 }
 0x949   : > { %4352 = vmatpush3.bf16.msra.mxu0 %v3119_v40 }
 0x94a   : > { %4353 = vmatprep.subr.bf16.mxu0 %v3120_v46  ;;  %4366 = vmatpush3.bf16.msra.mxu1 %v4494_v59  ;;  %v3361_v31 = vpop.permute.xlu0 %3360 }
 0x94d   : > { %4354 = vmatpush3.bf16.msra.mxu0 %v3120_v46 }
 0x950   : > { %4356 = vmatmul.mubr.msk.bf16.vlgmr.msra.gmra.mrb[36].mxu0 %vm1338_vm1, %v4490_v48 }
 0x951   : > { %4375 = vmatprep.mubr.msk.bf16.mxu0 %vm1338_vm1, %v4495_v23 }
 0xa23   : > { %v4357_v62 = vpop.f32.mrb[36].mxu0 }
 0xa24   : > { %v3205_v1 = vadd.f32 %v4357_v62, %v3139_v18  ;;  %v3196_v36 = vpop.f32.mrb[37].mxu0 }
 0xa25   : > { %v3197_v38 = vadd.f32 %v3196_v36, %v3129_v17  ;;  %v4358_v58 = vpop.f32.mrb[38].mxu0 }
 0xa26   : > { %v4071_v39 = vmul.f32 -1.442695, %v3205_v1  ;;  %v3208_v5 = vadd.f32 %v4358_v58, %v3144_v12  ;;  %v3199_v24 = vpop.f32.mrb[39].mxu0 }
 0xa27   : > { %v4069_v41 = vmul.f32 -1.442695, %v3197_v38  ;;  %v3200_v20 = vadd.f32 %v3199_v24, %v3134_v37 }
 0xa28   : > { %4691 = vpow2.f32 %v4071_v39  ;;  %v4072_v28 = vmul.f32 -1.442695, %v3208_v5 }
 0xa29   : > { %4693 = vpow2.f32 %v4069_v41  ;;  %v4070_v8 = vmul.f32 -1.442695, %v3200_v20 }
 0xa2a   : > { %4695 = vpow2.f32 %v4072_v28 }
 0xa2b   : > { %4697 = vpow2.f32 %v4070_v8 }
 0xa32   : > { %v4692_v55 = vpop.eup %4691 }
 0xa33   : > { %v4694_v57 = vpop.eup %4693  ;;  %v3225_v63 = vadd.f32 1.0, %v4692_v55 }
 0xa34   : > { %v4696_v29 = vpop.eup %4695  ;;  %v3223_v52 = vadd.f32 1.0, %v4694_v57 }
 0xa35   : > { %v4698_v53 = vpop.eup %4697  ;;  %4699 = vrcp.f32 %v3225_v63  ;;  %v3226_v4 = vadd.f32 1.0, %v4696_v29 }
 0xa36   : > { %4701 = vrcp.f32 %v3223_v52  ;;  %v3224_v2 = vadd.f32 1.0, %v4698_v53 }
 0xa37   : > { %4703 = vrcp.f32 %v3226_v4 }
 0xa38   : > { %4705 = vrcp.f32 %v3224_v2 }
 0xa3f   : > { %v4700_v3 = vpop.eup %4699 }
 0xa40   : > { %v4702_v25 = vpop.eup %4701  ;;  %v3237_v30 = vmul.f32 %v4700_v3, %v3205_v1 }
 0xa41   : > { %v4704_v9 = vpop.eup %4703  ;;  %v3235_v0 = vmul.f32 %v4702_v25, %v3197_v38 }
 0xa42   : > { %v4706_v26 = vpop.eup %4705  ;;  %3604 = vst.msk [vmem:[%s883_s6 + $0x10] sm:$0xff] %vm977_vm0, %v3237_v30  ;;  %v3238_v7 = vmul.f32 %v4704_v9, %v3208_v5 }
 0xa43   : > { %3602 = vst.msk [vmem:[%s883_s6] sm:$0xff] %vm977_vm0, %v3235_v0  ;;  %v3236_v19 = vmul.f32 %v4706_v26, %v3200_v20  ;;  %v4498_v26 = vld [vmem:[%s5651_s15 + $0xb8] sm:$0xff]  }
 0xa44   : > { %v3252_v21 = vpack.c.bf16 %v3238_v7, %v3237_v30  ;;  %3605 = vst.msk [vmem:[%s883_s6 + $0x18] sm:$0xff] %vm977_vm0, %v3238_v7 }
 0xa45   : > { %v3251_v22 = vpack.c.bf16 %v3236_v19, %v3235_v0  ;;  %3603 = vst.msk [vmem:[%s883_s6 + $0x8] sm:$0xff] %vm977_vm0, %v3236_v19 }
 0xa47   : > { %4367 = vmatprep.mubr.msk.bf16.mxu1 %vm977_vm0, %v3251_v22 }
 0xa48   : > { %4368 = vmatmul.mubr.msk.bf16.vlgmr.msra.gmra.mrb[44].mxu1 %vm977_vm0, %v3252_v21 }
 0xb1b   : > { %v4369_v6 = vpop.f32.mrb[44].mxu1 }
 0xb1c   : > { %v3334_v61 = vadd.f32 %v4369_v6, %v3241_v13  ;;  %v3317_v10 = vpop.f32.mrb[45].mxu1 }
 0xb1d   : > { %v3332_v14 = vadd.f32 %v3317_v10, %v3239_v27  ;;  %v4370_v15 = vpop.f32.mrb[46].mxu1 }
 0xb1e   : > { %v3335_v51 = vadd.f32 %v4370_v15, %v3242_v11  ;;  %v3320_v46 = vpop.f32.mrb[47].mxu1 }
 0xb1f   : > { %v3333_v40 = vadd.f32 %v3320_v46, %v3240_v35 }
 0xb20   : > { %v3342_v48 = vpack.c.bf16 %v3335_v51, %v3334_v61 }
 0xb21   : > { %v3341_v49 = vpack.c.bf16 %v3333_v40, %v3332_v14 }
 0xb23   : > { %4371 = vmatprep.subr.bf16.mxu0 %v3341_v49 }
 0xb24   : > { %4372 = vmatpush3.bf16.msra.mxu0 %v3341_v49 }
 0xb25   : > { %4373 = vmatprep.subr.bf16.mxu0 %v3342_v48 }
 0xb28   : > { %4374 = vmatpush3.bf16.msra.mxu0 %v3342_v48 }
 0xb2b   : > { %4376 = vmatmul.mubr.msk.bf16.vlgmr.msra.gmra.mrb[40].mxu0 %vm1338_vm1, %v4496_v54 }
 0xb2c   : > { %4383 = vmatprep.mubr.msk.bf16.mxu0 %vm1338_vm1, %v4497_v56 }
 0xbfe   : > { %v4377_v32 = vpop.f32.mrb[40].mxu0 }
 0xbff   : > { %v3427_v33 = vadd.f32 %v4377_v32, %v3361_v31  ;;  %v3418_v34 = vpop.f32.mrb[41].mxu0 }
 0xc00   : > { %v3419_v16 = vadd.f32 %v3418_v34, %v3351_v50  ;;  %v4378_v59 = vpop.f32.mrb[42].mxu0 }
 0xc01   : > { %v4093_v17 = vmul.f32 -1.442695, %v3427_v33  ;;  %v3430_v37 = vadd.f32 %v4378_v59, %v3366_v42  ;;  %v3421_v18 = vpop.f32.mrb[43].mxu0 }
 0xc02   : > { %v4091_v62 = vmul.f32 -1.442695, %v3419_v16  ;;  %v3422_v1 = vadd.f32 %v3421_v18, %v3356_v60 }
 0xc03   : > { %4707 = vpow2.f32 %v4093_v17  ;;  %v4094_v36 = vmul.f32 -1.442695, %v3430_v37 }
 0xc04   : > { %4709 = vpow2.f32 %v4091_v62  ;;  %v4092_v12 = vmul.f32 -1.442695, %v3422_v1 }
 0xc05   : > { %4711 = vpow2.f32 %v4094_v36 }
 0xc06   : > { %4713 = vpow2.f32 %v4092_v12 }
 0xc0d   : > { %v4708_v38 = vpop.eup %4707 }
 0xc0e   : > { %v4710_v58 = vpop.eup %4709  ;;  %v3447_v39 = vadd.f32 1.0, %v4708_v38 }
 0xc0f   : > { %v4712_v5 = vpop.eup %4711  ;;  %v3445_v24 = vadd.f32 1.0, %v4710_v58 }
 0xc10   : > { %v4714_v41 = vpop.eup %4713  ;;  %4715 = vrcp.f32 %v3447_v39  ;;  %v3448_v20 = vadd.f32 1.0, %v4712_v5 }
 0xc11   : > { %4717 = vrcp.f32 %v3445_v24  ;;  %v3446_v28 = vadd.f32 1.0, %v4714_v41 }
 0xc12   : > { %4719 = vrcp.f32 %v3448_v20 }
 0xc13   : > { %4721 = vrcp.f32 %v3446_v28 }
 0xc1a   : > { %v4716_v8 = vpop.eup %4715 }
 0xc1b   : > { %v4718_v55 = vpop.eup %4717  ;;  %v3459_v57 = vmul.f32 %v4716_v8, %v3427_v33 }
 0xc1c   : > { %v4720_v63 = vpop.eup %4719  ;;  %v3457_v29 = vmul.f32 %v4718_v55, %v3419_v16 }
 0xc1d   : > { %v4722_v52 = vpop.eup %4721  ;;  %3608 = vst.msk [vmem:[%s888_s0 + $0x10] sm:$0xff] %vm1525_vm2, %v3459_v57  ;;  %v3460_v53 = vmul.f32 %v4720_v63, %v3430_v37  ;;  %v3463_v2 = vadd.f32 %v3459_v57, %v5188_v47  ;;  %v3485_v47 = vpop.permute.xlu1 %3484 }
 0xc1e   : > { %3606 = vst.msk [vmem:[%s888_s0] sm:$0xff] %vm1525_vm2, %v3457_v29  ;;  %v3458_v4 = vmul.f32 %v4722_v52, %v3422_v1  ;;  %v3461_v25 = vadd.f32 %v3457_v29, %v5181_v43 }
 0xc1f   : > { %v3464_v3 = vadd.f32 %v3460_v53, %v5183_v44  ;;  %3609 = vst.msk [vmem:[%s888_s0 + $0x18] sm:$0xff] %vm1525_vm2, %v3460_v53  ;;  %v3480_v44 = vpop.permute.xlu0 %3479 }
 0xc20   : > { %v3462_v30 = vadd.f32 %v3458_v4, %v5185_v45  ;;  %3607 = vst.msk [vmem:[%s888_s0 + $0x8] sm:$0xff] %vm1525_vm2, %v3458_v4 }
 0xc21   : > { %v3471_v9 = vpack.c.bf16 %v3464_v3, %v3463_v2  ;;  %v3495_v21 = vpop.permute.xlu1 %3494 }
 0xc22   : > { %v3470_v0 = vpack.c.bf16 %v3462_v30, %v3461_v25 }
 0xc23   : > { %v3490_v7 = vpop.permute.xlu0 %3489 }
 0xc24   : > { %4379 = vmatprep.subr.bf16.mxu0 %v3470_v0 }
 0xc25   : > { %4380 = vmatpush3.bf16.msra.mxu0 %v3470_v0 }
 0xc26   : > { %4381 = vmatprep.subr.bf16.mxu0 %v3471_v9 }
 0xc29   : > { %4382 = vmatpush3.bf16.msra.mxu0 %v3471_v9 }
 0xc2c   : > { %4384 = vmatmul.mubr.msk.bf16.vlgmr.msra.gmra.mrb[44].mxu0 %vm1338_vm1, %v4498_v26 }
 0xcff   : > { %v4385_v43 = vpop.f32.mrb[44].mxu0 }
 0xd00   : > { %v3556_v19 = vadd.f32 %v4385_v43, %v3490_v7  ;;  %v3547_v45 = vpop.f32.mrb[45].mxu0 }
 0xd01   : > { %v3548_v22 = vadd.f32 %v3547_v45, %v3480_v44  ;;  %v4386_v23 = vpop.f32.mrb[46].mxu0 }
 0xd02   : > { %v4109_v13 = vmul.f32 -1.442695, %v3556_v19  ;;  %v3559_v6 = vadd.f32 %v4386_v23, %v3495_v21  ;;  %v3550_v27 = vpop.f32.mrb[47].mxu0 }
 0xd03   : > { %v4107_v61 = vmul.f32 -1.442695, %v3548_v22  ;;  %v3551_v10 = vadd.f32 %v3550_v27, %v3485_v47 }
 0xd04   : > { %4723 = vpow2.f32 %v4109_v13  ;;  %v4110_v11 = vmul.f32 -1.442695, %v3559_v6 }
 0xd05   : > { %4725 = vpow2.f32 %v4107_v61  ;;  %v4108_v14 = vmul.f32 -1.442695, %v3551_v10 }
 0xd06   : > { %4727 = vpow2.f32 %v4110_v11 }
 0xd07   : > { %4729 = vpow2.f32 %v4108_v14 }
 0xd0e   : > { %v4724_v15 = vpop.eup %4723 }
 0xd0f   : > { %v4726_v35 = vpop.eup %4725  ;;  %v3576_v51 = vadd.f32 1.0, %v4724_v15 }
 0xd10   : > { %v4728_v46 = vpop.eup %4727  ;;  %v3574_v40 = vadd.f32 1.0, %v4726_v35 }
 0xd11   : > { %v4730_v48 = vpop.eup %4729  ;;  %4731 = vrcp.f32 %v3576_v51  ;;  %v3577_v49 = vadd.f32 1.0, %v4728_v46 }
 0xd12   : > { %4733 = vrcp.f32 %v3574_v40  ;;  %v3575_v54 = vadd.f32 1.0, %v4730_v48 }
 0xd13   : > { %4735 = vrcp.f32 %v3577_v49 }
 0xd14   : > { %4737 = vrcp.f32 %v3575_v54 }
 0xd1b   : > { %v4732_v56 = vpop.eup %4731 }
 0xd1c   : > { %v4734_v50 = vpop.eup %4733  ;;  %v3588_v60 = vmul.f32 %v4732_v56, %v3556_v19 }
 0xd1d   : > { %v4736_v31 = vpop.eup %4735  ;;  %v3586_v32 = vmul.f32 %v4734_v50, %v3548_v22 }
 0xd1e   : > { %v4738_v33 = vpop.eup %4737  ;;  %3612 = vst.msk [vmem:[%s893_s28 + $0x10] sm:$0xff] %vm1525_vm2, %v3588_v60  ;;  %v3589_v34 = vmul.f32 %v4736_v31, %v3559_v6 }
 0xd1f   : > { %3610 = vst.msk [vmem:[%s893_s28] sm:$0xff] %vm1525_vm2, %v3586_v32  ;;  %v3587_v42 = vmul.f32 %v4738_v33, %v3551_v10 }
 0xd20   : > { %3613 = vst.msk [vmem:[%s893_s28 + $0x18] sm:$0xff] %vm1525_vm2, %v3589_v34 }
 0xd21   : > { %3611 = vst.msk [vmem:[%s893_s28 + $0x8] sm:$0xff] %vm1525_vm2, %v3587_v42 }
 0xd22 PF: > { %s36_s29 = sadd.s32 1, %s4745_s29  }
 0xd23   : > { %p33_p4 = scmp.ge.s32.totalorder %s36_s29, 4  }
 0xd25   :  { %35 = sbr.rel (!%p33_p4) target bundleno = 12 (0xc), region = 212 }

</bundles_post_ra>
